<compile_context>
chip_gen: v7x
topology: tpu7x:2x2x1
jax: 0.10.0
libtpu: 0.0.40
codegen_flags: <defaults>
</compile_context>

<pallas_src>
import jax
import jax.numpy as jnp
from jax import lax
from jax.experimental import pallas as pl
from jax.experimental.pallas import tpu as pltpu

# logical feature dims (PyTorch module)
D_IN, D_H1, D_H2, D_H3, D_OUT = 400, 500, 500, 300, 5
# lane-padded feature dims (multiples of 128); input dim stays un-padded
P_H1, P_H2, P_H3, P_OUT = 512, 512, 384, 128


def _round_up(x, m):
    return (x + m - 1) // m * m


def _choose_tb(batch, tb_max=1024):
    """Batch tile: multiple of 16 (bf16 sublanes); >=2 grid steps when possible
    so the 'parallel' axis uses both v7x TensorCores; capped at tb_max."""
    if batch <= 16:
        return 16
    n_steps = max(2, pl.cdiv(batch, tb_max))
    tb = _round_up(pl.cdiv(batch, n_steps), 16)
    return min(tb, tb_max)


def mlp_kernel(x_ref,
               w1_ref, b1_ref,
               w2_ref, b2_ref,
               w3_ref, b3_ref,
               w4_ref, b4_ref,
               o_ref):
    # x tile: (tb, 400) f32 -> bf16 (VPU cast hidden under the MXU work).
    x = x_ref[...].astype(jnp.bfloat16)

    h = jnp.dot(x, w1_ref[...], preferred_element_type=jnp.float32)
    h = jnp.maximum(h + b1_ref[...], 0.0).astype(jnp.bfloat16)

    h = jnp.dot(h, w2_ref[...], preferred_element_type=jnp.float32)
    h = jnp.maximum(h + b2_ref[...], 0.0).astype(jnp.bfloat16)

    h = jnp.dot(h, w3_ref[...], preferred_element_type=jnp.float32)
    h = jnp.maximum(h + b3_ref[...], 0.0).astype(jnp.bfloat16)

    logits = jnp.dot(h, w4_ref[...], preferred_element_type=jnp.float32) + b4_ref[...]

    # Mask padded output lanes so they carry zero softmax mass.
    col = lax.broadcasted_iota(jnp.int32, logits.shape, dimension=1)
    logits = jnp.where(col < D_OUT, logits, -jnp.inf)

    # Numerically-stable softmax, exact normalization.
    m = jnp.max(logits, axis=-1, keepdims=True)
    e = jnp.exp(logits - m)
    denom = jnp.sum(e, axis=-1, keepdims=True)
    o_ref[...] = (e * (1.0 / denom)).astype(o_ref.dtype)


def net_forward(x, params, *, tb_max=1024):
    """x: (B, 400) float32.  Returns (B, 5) float32 softmax probabilities."""
    B = x.shape[0]
    x = x.astype(jnp.float32)
    tb = _choose_tb(B, tb_max)
    grid = (pl.cdiv(B, tb),)

    row_spec = lambda i: (i, 0)   # x / out tiles march over the batch
    const = lambda i: (0, 0)      # weights & biases stay VMEM-resident

    out = pl.pallas_call(
        mlp_kernel,
        out_shape=jax.ShapeDtypeStruct((B, P_OUT), jnp.bfloat16),
        grid=grid,
        in_specs=[
            pl.BlockSpec((tb, D_IN), row_spec),
            pl.BlockSpec((D_IN, P_H1), const), pl.BlockSpec((1, P_H1), const),
            pl.BlockSpec((P_H1, P_H2), const), pl.BlockSpec((1, P_H2), const),
            pl.BlockSpec((P_H2, P_H3), const), pl.BlockSpec((1, P_H3), const),
            pl.BlockSpec((P_H3, P_OUT), const), pl.BlockSpec((1, P_OUT), const),
        ],
        out_specs=pl.BlockSpec((tb, P_OUT), row_spec),
        compiler_params=pltpu.CompilerParams(
            dimension_semantics=("parallel",),
            vmem_limit_bytes=32 * 1024 * 1024),
    )(x,
      params["w1"], params["b1"],
      params["w2"], params["b2"],
      params["w3"], params["b3"],
      params["w4"], params["b4"])

    return out[:, :D_OUT].astype(jnp.float32)


def init_params(key):
    """nn.Linear-style U(-1/sqrt(fan_in), 1/sqrt(fan_in)) init.

    Weights stored transposed (in, out), zero-padded on the lane-aligned
    output dims, bf16.  w1 keeps its true 400-row input dim (x is fed
    un-padded).  Biases stored (1, out_pad) in f32 (added after f32 accum).
    """
    dims = [(D_IN, D_H1, D_IN, P_H1),
            (D_H1, D_H2, P_H1, P_H2),
            (D_H2, D_H3, P_H2, P_H3),
            (D_H3, D_OUT, P_H3, P_OUT)]
    params = {}
    for i, (fi, fo, pi, po) in enumerate(dims, start=1):
        key, kw, kb = jax.random.split(key, 3)
        bound = 1.0 / (fi ** 0.5)
        w = jax.random.uniform(kw, (fi, fo), jnp.float32, -bound, bound)
        b = jax.random.uniform(kb, (fo,), jnp.float32, -bound, bound)
        params[f"w{i}"] = (jnp.zeros((pi, po), jnp.float32)
                           .at[:fi, :fo].set(w).astype(jnp.bfloat16))
        params[f"b{i}"] = jnp.zeros((1, po), jnp.float32).at[0, :fo].set(b)
    return params


def _reference(x, params):
    """Pure-JAX reference mirroring the kernel's bf16 compute path."""
    h = x.astype(jnp.bfloat16)
    for i in range(1, 4):
        h = jnp.dot(h, params[f"w{i}"],
                    preferred_element_type=jnp.float32) + params[f"b{i}"]
        h = jnp.maximum(h, 0.0).astype(jnp.bfloat16)
    logits = jnp.dot(h, params["w4"],
                     preferred_element_type=jnp.float32) + params["b4"]
    return jax.nn.softmax(logits[:, :D_OUT], axis=-1)


if __name__ == "__main__":
    key = jax.random.PRNGKey(0)
    kx, kx2, kp = jax.random.split(key, 3)
    params = init_params(kp)

    # Small single-tile batch.
    B = 8
    x = jax.random.normal(kx, (B, D_IN), dtype=jnp.float32)
    out = net_forward(x, params)
    jax.block_until_ready(out)
    assert out.shape == (B, D_OUT)
    assert jnp.allclose(jnp.sum(out, axis=-1), 1.0, atol=2e-2)
    ref = _reference(x, params)
    assert jnp.allclose(out, ref, atol=1e-2), float(jnp.max(jnp.abs(out - ref)))

    # Multi-tile batch with a ragged (partial) last block.
    B2 = 40
    x2 = jax.random.normal(kx2, (B2, D_IN), dtype=jnp.float32)
    out2 = net_forward(x2, params)
    jax.block_until_ready(out2)
    assert out2.shape == (B2, D_OUT)
    assert jnp.allclose(jnp.sum(out2, axis=-1), 1.0, atol=2e-2)
    ref2 = _reference(x2, params)
    assert jnp.allclose(out2, ref2, atol=1e-2), float(jnp.max(jnp.abs(out2 - ref2)))

    print("KERNEL_OK")
</pallas_src>

<mosaic_0001>
module attributes {stable_mosaic.version = 11 : i64} {
  func.func @mlp_kernel(%arg0: i32, %arg1: memref<16x400xf32, #tpu.memory_space<vmem>>, %arg2: memref<400x512xbf16, #tpu.memory_space<vmem>>, %arg3: memref<1x512xf32, #tpu.memory_space<vmem>>, %arg4: memref<512x512xbf16, #tpu.memory_space<vmem>>, %arg5: memref<1x512xf32, #tpu.memory_space<vmem>>, %arg6: memref<512x384xbf16, #tpu.memory_space<vmem>>, %arg7: memref<1x384xf32, #tpu.memory_space<vmem>>, %arg8: memref<384x128xbf16, #tpu.memory_space<vmem>>, %arg9: memref<1x128xf32, #tpu.memory_space<vmem>>, %arg10: memref<16x128xbf16, #tpu.memory_space<vmem>>) attributes {dimension_semantics = [#tpu.dimension_semantics<parallel>], iteration_bounds = array<i64: 1>, scalar_prefetch = 0 : i64, scratch_operands = 0 : i64, tpu.core_type = #tpu.core_type<tc>, window_params = [{transform_indices = @transform_0, window_bounds = array<i64: 16, 400>}, {pipeline_mode = #tpu.pipeline_mode<synchronous>, transform_indices = @transform_1, window_bounds = array<i64: 400, 512>}, {pipeline_mode = #tpu.pipeline_mode<synchronous>, transform_indices = @transform_2, window_bounds = array<i64: 1, 512>}, {pipeline_mode = #tpu.pipeline_mode<synchronous>, transform_indices = @transform_3, window_bounds = array<i64: 512, 512>}, {pipeline_mode = #tpu.pipeline_mode<synchronous>, transform_indices = @transform_4, window_bounds = array<i64: 1, 512>}, {pipeline_mode = #tpu.pipeline_mode<synchronous>, transform_indices = @transform_5, window_bounds = array<i64: 512, 384>}, {pipeline_mode = #tpu.pipeline_mode<synchronous>, transform_indices = @transform_6, window_bounds = array<i64: 1, 384>}, {pipeline_mode = #tpu.pipeline_mode<synchronous>, transform_indices = @transform_7, window_bounds = array<i64: 384, 128>}, {pipeline_mode = #tpu.pipeline_mode<synchronous>, transform_indices = @transform_8, window_bounds = array<i64: 1, 128>}, {transform_indices = @transform_9, window_bounds = array<i64: 16, 128>}]} {
    %c0 = arith.constant 0 : index
    %c0_0 = arith.constant 0 : index
    %0 = vector.load %arg1[%c0, %c0_0] : memref<16x400xf32, #tpu.memory_space<vmem>>, vector<16x400xf32>
    %1 = arith.truncf %0 : vector<16x400xf32> to vector<16x400xbf16>
    %c0_1 = arith.constant 0 : index
    %c0_2 = arith.constant 0 : index
    %2 = vector.load %arg2[%c0_1, %c0_2] : memref<400x512xbf16, #tpu.memory_space<vmem>>, vector<400x512xbf16>
    %cst = arith.constant dense<0.000000e+00> : vector<16x512xf32>
    %3 = tpu.matmul %1, %2, %cst {dimension_numbers = #tpu.dot_dimension_numbers<[1], [0], [0], [1], [0, 0, 1, 1], [], []>} : vector<16x400xbf16>, vector<400x512xbf16>, vector<16x512xf32> -> vector<16x512xf32>
    %c0_3 = arith.constant 0 : index
    %c0_4 = arith.constant 0 : index
    %4 = vector.load %arg3[%c0_3, %c0_4] : memref<1x512xf32, #tpu.memory_space<vmem>>, vector<1x512xf32>
    %5 = vector.broadcast %4 : vector<1x512xf32> to vector<16x512xf32>
    %6 = arith.addf %3, %5 : vector<16x512xf32>
    %cst_5 = arith.constant 0.000000e+00 : f32
    %7 = vector.broadcast %cst_5 : f32 to vector<16x512xf32>
    %8 = arith.maximumf %6, %7 : vector<16x512xf32>
    %9 = arith.truncf %8 : vector<16x512xf32> to vector<16x512xbf16>
    %c0_6 = arith.constant 0 : index
    %c0_7 = arith.constant 0 : index
    %10 = vector.load %arg4[%c0_6, %c0_7] : memref<512x512xbf16, #tpu.memory_space<vmem>>, vector<512x512xbf16>
    %cst_8 = arith.constant dense<0.000000e+00> : vector<16x512xf32>
    %11 = tpu.matmul %9, %10, %cst_8 {dimension_numbers = #tpu.dot_dimension_numbers<[1], [0], [0], [1], [0, 0, 1, 1], [], []>} : vector<16x512xbf16>, vector<512x512xbf16>, vector<16x512xf32> -> vector<16x512xf32>
    %c0_9 = arith.constant 0 : index
    %c0_10 = arith.constant 0 : index
    %12 = vector.load %arg5[%c0_9, %c0_10] : memref<1x512xf32, #tpu.memory_space<vmem>>, vector<1x512xf32>
    %13 = vector.broadcast %12 : vector<1x512xf32> to vector<16x512xf32>
    %14 = arith.addf %11, %13 : vector<16x512xf32>
    %cst_11 = arith.constant 0.000000e+00 : f32
    %15 = vector.broadcast %cst_11 : f32 to vector<16x512xf32>
    %16 = arith.maximumf %14, %15 : vector<16x512xf32>
    %17 = arith.truncf %16 : vector<16x512xf32> to vector<16x512xbf16>
    %c0_12 = arith.constant 0 : index
    %c0_13 = arith.constant 0 : index
    %18 = vector.load %arg6[%c0_12, %c0_13] : memref<512x384xbf16, #tpu.memory_space<vmem>>, vector<512x384xbf16>
    %cst_14 = arith.constant dense<0.000000e+00> : vector<16x384xf32>
    %19 = tpu.matmul %17, %18, %cst_14 {dimension_numbers = #tpu.dot_dimension_numbers<[1], [0], [0], [1], [0, 0, 1, 1], [], []>} : vector<16x512xbf16>, vector<512x384xbf16>, vector<16x384xf32> -> vector<16x384xf32>
    %c0_15 = arith.constant 0 : index
    %c0_16 = arith.constant 0 : index
    %20 = vector.load %arg7[%c0_15, %c0_16] : memref<1x384xf32, #tpu.memory_space<vmem>>, vector<1x384xf32>
    %21 = vector.broadcast %20 : vector<1x384xf32> to vector<16x384xf32>
    %22 = arith.addf %19, %21 : vector<16x384xf32>
    %cst_17 = arith.constant 0.000000e+00 : f32
    %23 = vector.broadcast %cst_17 : f32 to vector<16x384xf32>
    %24 = arith.maximumf %22, %23 : vector<16x384xf32>
    %25 = arith.truncf %24 : vector<16x384xf32> to vector<16x384xbf16>
    %c0_18 = arith.constant 0 : index
    %c0_19 = arith.constant 0 : index
    %26 = vector.load %arg8[%c0_18, %c0_19] : memref<384x128xbf16, #tpu.memory_space<vmem>>, vector<384x128xbf16>
    %cst_20 = arith.constant dense<0.000000e+00> : vector<16x128xf32>
    %27 = tpu.matmul %25, %26, %cst_20 {dimension_numbers = #tpu.dot_dimension_numbers<[1], [0], [0], [1], [0, 0, 1, 1], [], []>} : vector<16x384xbf16>, vector<384x128xbf16>, vector<16x128xf32> -> vector<16x128xf32>
    %c0_21 = arith.constant 0 : index
    %c0_22 = arith.constant 0 : index
    %28 = vector.load %arg9[%c0_21, %c0_22] : memref<1x128xf32, #tpu.memory_space<vmem>>, vector<1x128xf32>
    %29 = vector.broadcast %28 : vector<1x128xf32> to vector<16x128xf32>
    %30 = arith.addf %27, %29 : vector<16x128xf32>
    %31 = tpu.iota {dimensions = array<i32: 1>} : vector<16x128xi32>
    %c5_i32 = arith.constant 5 : i32
    %32 = vector.broadcast %c5_i32 : i32 to vector<16x128xi32>
    %33 = arith.cmpi slt, %31, %32 : vector<16x128xi32>
    %cst_23 = arith.constant 0xFF800000 : f32
    %34 = vector.broadcast %cst_23 : f32 to vector<16x128xf32>
    %35 = arith.select %33, %30, %34 : vector<16x128xi1>, vector<16x128xf32>
    %cst_24 = arith.constant dense<0xFF800000> : vector<16xf32>
    %36 = vector.multi_reduction <maximumf>, %35, %cst_24 [1] : vector<16x128xf32> to vector<16xf32>
    %37 = vector.shape_cast %36 : vector<16xf32> to vector<16x1xf32>
    %38 = vector.broadcast %37 : vector<16x1xf32> to vector<16x128xf32>
    %39 = arith.subf %35, %38 : vector<16x128xf32>
    %40 = math.exp %39 : vector<16x128xf32>
    %cst_25 = arith.constant dense<0.000000e+00> : vector<16xf32>
    %41 = vector.multi_reduction <add>, %40, %cst_25 [1] : vector<16x128xf32> to vector<16xf32>
    %42 = vector.shape_cast %41 : vector<16xf32> to vector<16x1xf32>
    %cst_26 = arith.constant 1.000000e+00 : f32
    %43 = vector.broadcast %cst_26 : f32 to vector<16x1xf32>
    %44 = arith.divf %43, %42 : vector<16x1xf32>
    %45 = vector.broadcast %44 : vector<16x1xf32> to vector<16x128xf32>
    %46 = arith.mulf %40, %45 : vector<16x128xf32>
    %47 = arith.truncf %46 : vector<16x128xf32> to vector<16x128xbf16>
    %c0_27 = arith.constant 0 : index
    %c0_28 = arith.constant 0 : index
    %48 = vector.load %arg10[%c0_27, %c0_28] : memref<16x128xbf16, #tpu.memory_space<vmem>>, vector<16x128xbf16>
    tpu.vector_store %arg10[%c0_27, %c0_28], %47 {strides = array<i32>} : memref<16x128xbf16, #tpu.memory_space<vmem>>, vector<16x128xbf16>,
    return
  }
  func.func @transform_0(%arg0: i32) -> (i32, i32) {
    %c0_i32 = arith.constant 0 : i32
    %c0_i32_0 = arith.constant 0 : i32
    return %arg0, %c0_i32 : i32, i32
  }
  func.func @transform_1(%arg0: i32) -> (i32, i32) {
    %c0_i32 = arith.constant 0 : i32
    %c0_i32_0 = arith.constant 0 : i32
    %c0_i32_1 = arith.constant 0 : i32
    return %c0_i32, %c0_i32_0 : i32, i32
  }
  func.func @transform_2(%arg0: i32) -> (i32, i32) {
    %c0_i32 = arith.constant 0 : i32
    %c0_i32_0 = arith.constant 0 : i32
    %c0_i32_1 = arith.constant 0 : i32
    return %c0_i32, %c0_i32_0 : i32, i32
  }
  func.func @transform_3(%arg0: i32) -> (i32, i32) {
    %c0_i32 = arith.constant 0 : i32
    %c0_i32_0 = arith.constant 0 : i32
    %c0_i32_1 = arith.constant 0 : i32
    return %c0_i32, %c0_i32_0 : i32, i32
  }
  func.func @transform_4(%arg0: i32) -> (i32, i32) {
    %c0_i32 = arith.constant 0 : i32
    %c0_i32_0 = arith.constant 0 : i32
    %c0_i32_1 = arith.constant 0 : i32
    return %c0_i32, %c0_i32_0 : i32, i32
  }
  func.func @transform_5(%arg0: i32) -> (i32, i32) {
    %c0_i32 = arith.constant 0 : i32
    %c0_i32_0 = arith.constant 0 : i32
    %c0_i32_1 = arith.constant 0 : i32
    return %c0_i32, %c0_i32_0 : i32, i32
  }
  func.func @transform_6(%arg0: i32) -> (i32, i32) {
    %c0_i32 = arith.constant 0 : i32
    %c0_i32_0 = arith.constant 0 : i32
    %c0_i32_1 = arith.constant 0 : i32
    return %c0_i32, %c0_i32_0 : i32, i32
  }
  func.func @transform_7(%arg0: i32) -> (i32, i32) {
    %c0_i32 = arith.constant 0 : i32
    %c0_i32_0 = arith.constant 0 : i32
    %c0_i32_1 = arith.constant 0 : i32
    return %c0_i32, %c0_i32_0 : i32, i32
  }
  func.func @transform_8(%arg0: i32) -> (i32, i32) {
    %c0_i32 = arith.constant 0 : i32
    %c0_i32_0 = arith.constant 0 : i32
    %c0_i32_1 = arith.constant 0 : i32
    return %c0_i32, %c0_i32_0 : i32, i32
  }
  func.func @transform_9(%arg0: i32) -> (i32, i32) {
    %c0_i32 = arith.constant 0 : i32
    %c0_i32_0 = arith.constant 0 : i32
    return %arg0, %c0_i32 : i32, i32
  }
}

</mosaic_0001>

<bundles_post_ra>
// kernel: tpu_custom_call.1
= control target key start
LH: loop header
LB: loop body
LE: loop exit
PB: predicated region body
PF: predicated region fallthrough
CT: control target
= control target key end

     0   :  { %14 = vsyncpa [#allocation3], 0  ;;  %s4428_s0 = inlined_call_operand.hbm [shape: f32[8,400], index: 0, kind: input, shape index: {}]   ;;  %s4429_s1 = inlined_call_operand.hbm [shape: bf16[400,512], index: 1, kind: input, shape index: {}]   ;;  %s4430_s2 = inlined_call_operand.vmem [shape: f32[1,512], index: 2, kind: input, shape index: {}]   ;;  %s4431_s3 = inlined_call_operand.hbm [shape: bf16[512,512], index: 3, kind: input, shape index: {}]   ;;  %s4432_s4 = inlined_call_operand.vmem [shape: f32[1,512], index: 4, kind: input, shape index: {}]   ;;  %s4433_s5 = inlined_call_operand.hbm [shape: bf16[512,384], index: 5, kind: input, shape index: {}]   ;;  %s4434_s6 = inlined_call_operand.vmem [shape: f32[1,384], index: 6, kind: input, shape index: {}]   ;;  %s4435_s7 = inlined_call_operand.hbm [shape: bf16[384,128], index: 7, kind: input, shape index: {}]   ;;  %s4436_s8 = inlined_call_operand.vmem [shape: f32[1,128], index: 8, kind: input, shape index: {}]   ;;  %s4437_s9 = inlined_call_operand.hbm [shape: bf16[8,128], index: 9, kind: output, shape index: {}]  }
   0x1   :  { %15 = vsyncpa [#allocation6], 0 }
   0x2   :  { %16 = vsyncpa [#allocation9], 0 }
   0x3   :  { %17 = vsyncpa [#allocation4], 0 }
   0x4   :  { %22 = vsyncadd [#allocation3], 512  ;;  %s4220_s30 = smov [#allocation5]   ;;  %s4080_s13 = scalar_lea.hbm %s4429_s1, 12800 }
   0x5   :  { %s35_s10 = sshll.u32 %s4220_s30, 4  ;;  %p4081_p0 = scmp.ne.s32.totalorder %s4429_s1, %s4080_s13  ;;  %s36_s10 = int_to_ptr.vmem [resolvable:$true] %s35_s10 }
   0x6   :  { %p4084_p1 = scmp.lt.u32.totalorder %s4080_s13, %s4429_s1 }
   0x8   :  { %p4086_p2 = pnand %p4084_p1, %p4081_p0 }
   0xa   :  { %4089 = shalt.err (!%p4086_p2)
}
   0xb   :  { %s4090_s18 = scalar_lea.vmem %s36_s10, 12800  ;;  %p4095_p4 = scmp.lt.s32.totalorder %s36_s10, %s36_s10 }
   0xc   :  { %p4091_p3 = scmp.ne.s32.totalorder %s36_s10, %s4090_s18  ;;  %p4096_p5 = scmp.lt.s32.totalorder %s4090_s18, %s4090_s18 }
   0xe   :  { %p4097_p6 = por %p4096_p5, %p4095_p4 }
  0x10   :  { %p4098_p7 = pnand %p4097_p6, %p4091_p3 }
  0x12   :  { %4101 = shalt.err (!%p4098_p7)
}
  0x13   :  { %s4221_s19 = smov 256   ;;  %s4222_s20 = smov 16  }
  0x14   :  { %41 = dma.hbm_to_vmem [thread:$0]  %s4429_s1, 12800, %s36_s10, [#allocation6], %s4221_s19, %s4221_s19, %s4222_s20  }
  0x15   :  { %s4223_s23 = smov [#allocation8]   ;;  %s4102_s27 = scalar_lea.hbm %s4433_s5, 12288 }
  0x16   :  { %s63_s24 = sshll.u32 %s4223_s23, 4  ;;  %p4103_p8 = scmp.ne.s32.totalorder %s4433_s5, %s4102_s27  ;;  %s64_s24 = int_to_ptr.vmem [resolvable:$true] %s63_s24 }
  0x17   :  { %p4106_p9 = scmp.lt.u32.totalorder %s4102_s27, %s4433_s5 }
  0x19   :  { %p4108_p10 = pnand %p4106_p9, %p4103_p8 }
  0x1b   :  { %4111 = shalt.err (!%p4108_p10)
}
  0x1c   :  { %s4112_s12 = scalar_lea.vmem %s64_s24, 12288  ;;  %p4117_p12 = scmp.lt.s32.totalorder %s64_s24, %s64_s24 }
  0x1d   :  { %p4113_p11 = scmp.ne.s32.totalorder %s64_s24, %s4112_s12  ;;  %p4118_p13 = scmp.lt.s32.totalorder %s4112_s12, %s4112_s12 }
  0x1f   :  { %p4119_p0 = por %p4118_p13, %p4117_p12 }
  0x21   :  { %p4120_p1 = pnand %p4119_p0, %p4113_p11 }
  0x23   :  { %4123 = shalt.err (!%p4120_p1)
}
  0x24   :  { %s4224_s1 = smov 192   ;;  %s4225_s10 = smov 12  }
  0x25   :  { %69 = dma.hbm_to_vmem [thread:$0]  %s4433_s5, 12288, %s64_s24, [#allocation9], %s4224_s1, %s4224_s1, %s4225_s10  }
  0x26   :  { %s4226_s15 = smov [#allocation2]   ;;  %s4124_s21 = scalar_lea.hbm %s4428_s0, 512 }
  0x27   :  { %s23_s16 = sshll.u32 %s4226_s15, 4  ;;  %p4125_p2 = scmp.ne.s32.totalorder %s4428_s0, %s4124_s21  ;;  %s24_s16 = int_to_ptr.vmem [resolvable:$true] %s23_s16 }
  0x28   :  { %p4128_p3 = scmp.lt.u32.totalorder %s4124_s21, %s4428_s0 }
  0x2a   :  { %p4130_p4 = pnand %p4128_p3, %p4125_p2 }
  0x2c   :  { %4133 = shalt.err (!%p4130_p4)
}
  0x2d   :  { %s4134_s27 = scalar_lea.vmem %s24_s16, 512  ;;  %s4138_s5 = scalar_lea.vmem %s24_s16, 1024 }
  0x2e   :  { %p4135_p5 = scmp.ne.s32.totalorder %s24_s16, %s4134_s27  ;;  %p4139_p6 = scmp.lt.s32.totalorder %s24_s16, %s24_s16 }
  0x2f   :  { %p4140_p7 = scmp.lt.s32.totalorder %s4138_s5, %s4134_s27 }
  0x31   :  { %p4141_p8 = por %p4140_p7, %p4139_p6 }
  0x33   :  { %p4142_p9 = pnand %p4141_p8, %p4135_p5 }
  0x35   :  { %4145 = shalt.err (!%p4142_p9)
}
  0x36   :  { %s4227_s24 = smov 512   ;;  %s4228_s28 = smov 32  }
  0x37   :  { %29 = dma.hbm_to_vmem [thread:$0]  %s4428_s0, 512, %s24_s16, [#allocation3], %s4227_s24, %s4227_s24, %s4228_s28  }
  0x38   :  { %s4229_s11 = smov [#allocation7]   ;;  %s4230_s1 = smov [#allocation10]  }
  0x39   :  { %s49_s12 = sshll.u32 %s4229_s11, 4  ;;  %s77_s10 = sshll.u32 %s4230_s1, 4  ;;  %s50_s12 = int_to_ptr.vmem [resolvable:$true] %s49_s12  ;;  %s78_s10 = int_to_ptr.vmem [resolvable:$true] %s77_s10 }
  0x3a   :  { %s4146_s15 = scalar_lea.hbm %s4431_s3, 16384 }
  0x3b   :  { %p4147_p10 = scmp.ne.s32.totalorder %s4431_s3, %s4146_s15  ;;  %p4150_p11 = scmp.lt.u32.totalorder %s4146_s15, %s4431_s3 }
  0x3d   :  { %p4152_p12 = pnand %p4150_p11, %p4147_p10 }
  0x3f   :  { %4155 = shalt.err (!%p4152_p12)
}
  0x40   :  { %s4156_s0 = scalar_lea.vmem %s50_s12, 16384  ;;  %p4161_p0 = scmp.lt.s32.totalorder %s50_s12, %s50_s12 }
  0x41   :  { %p4157_p13 = scmp.ne.s32.totalorder %s50_s12, %s4156_s0  ;;  %p4162_p1 = scmp.lt.s32.totalorder %s4156_s0, %s4156_s0 }
  0x43   :  { %p4163_p2 = por %p4162_p1, %p4161_p0 }
  0x45   :  { %p4164_p3 = pnand %p4163_p2, %p4157_p13 }
  0x47   :  { %4167 = shalt.err (!%p4164_p3)
}
  0x48   :  { %55 = dma.hbm_to_vmem [thread:$0]  %s4431_s3, 16384, %s50_s12, [#allocation6], %s4221_s19, %s4221_s19, %s4222_s20  }
  0x49   :  { %s4168_s27 = scalar_lea.hbm %s4435_s7, 3072 }
  0x4a   :  { %p4169_p4 = scmp.ne.s32.totalorder %s4435_s7, %s4168_s27  ;;  %p4172_p5 = scmp.lt.u32.totalorder %s4168_s27, %s4435_s7 }
  0x4c   :  { %p4174_p6 = pnand %p4172_p5, %p4169_p4 }
  0x4e   :  { %4177 = shalt.err (!%p4174_p6)
}
  0x4f   :  { %s4178_s30 = scalar_lea.vmem %s78_s10, 3072  ;;  %p4183_p8 = scmp.lt.s32.totalorder %s78_s10, %s78_s10 }
  0x50   :  { %p4179_p7 = scmp.ne.s32.totalorder %s78_s10, %s4178_s30  ;;  %p4184_p9 = scmp.lt.s32.totalorder %s4178_s30, %s4178_s30 }
  0x52   :  { %p4185_p10 = por %p4184_p9, %p4183_p8 }
  0x54   :  { %p4186_p11 = pnand %p4185_p10, %p4179_p7 }
  0x56   :  { %4189 = shalt.err (!%p4186_p11)
}
  0x57   :  { %s4231_s3 = smov 64   ;;  %s4232_s19 = smov 4  }
  0x58   :  { %83 = dma.hbm_to_vmem [thread:$0]  %s4435_s7, 3072, %s78_s10, [#allocation9], %s4231_s3, %s4231_s3, %s4232_s19  }
  0x59   :  { %4212 = dma.done.wait [#allocation3], 1024  }
  0x5a   :  { %4213 = vsyncadd [#allocation3], 4294966272 }
  0x5b   :  { %4214 = dma.done.wait [#allocation6], 29184  }
  0x5c   :  { %4215 = vsyncadd [#allocation6], 4294938112 }
  0x5d   :  { %4216 = dma.done.wait [#allocation9], 15360  }
  0x5e   :  { %4217 = vsyncadd [#allocation9], 4294951936  ;;  %v3578_v0 = vld [vmem:[#allocation5 + $0x4] ss:$16 sps:$4 sm:$0xff]   ;;  %v3580_v1 = vld [vmem:[#allocation5] ss:$16 sps:$4 sm:$0xff]  }
  0x5f   :  { %740 = vmatprep.subr.bf16.mxu0 %v3578_v0  ;;  %v3581_v2 = vld [vmem:[#allocation5 + $0x24] ss:$16 sps:$4 sm:$0xff]   ;;  %v3583_v3 = vld [vmem:[#allocation5 + $0x20] ss:$16 sps:$4 sm:$0xff]   ;;  %v3599_v7 = vld [vmem:[#allocation5 + $0xc] ss:$16 sps:$4 sm:$0xff]  }
  0x60   :  { %741 = vmatpush1.bf16.msra.mxu0 %v3580_v1  ;;  %v3584_v4 = vld [vmem:[#allocation5 + $0x44] ss:$16 sps:$4 sm:$0xff]   ;;  %v3586_v5 = vld [vmem:[#allocation5 + $0x40] ss:$16 sps:$4 sm:$0xff]   ;;  %v3601_v8 = vld [vmem:[#allocation5 + $0x8] ss:$16 sps:$4 sm:$0xff]   ;;  %826 = vmatprep.subr.bf16.mxu1 %v3599_v7 }
  0x61   :  { %742 = vmatprep.subr.bf16.mxu0 %v3581_v2  ;;  %v3587_v6 = vld [vmem:[#allocation5 + $0x64] ss:$16 sps:$4 sm:$0xff]   ;;  %v3589_v9 = vld [vmem:[#allocation5 + $0x60] ss:$16 sps:$4 sm:$0xff]   ;;  %v3605_v11 = vld [vmem:[#allocation5 + $0x2c] ss:$16 sps:$4 sm:$0xff]   ;;  %827 = vmatpush1.bf16.msra.mxu1 %v3601_v8 }
  0x62   :  { %v3590_v10 = vld [vmem:[#allocation5 + $0x84] ss:$16 sps:$4 sm:$0xff]   ;;  %v3607_v12 = vld [vmem:[#allocation5 + $0x28] ss:$16 sps:$4 sm:$0xff]   ;;  %828 = vmatprep.subr.bf16.mxu1 %v3605_v11  ;;  %v3592_v13 = vld [vmem:[#allocation5 + $0x80] ss:$16 sps:$4 sm:$0xff]  }
  0x63   :  { %v3611_v14 = vld [vmem:[#allocation5 + $0x4c] ss:$16 sps:$4 sm:$0xff]   ;;  %v3593_v15 = vld [vmem:[#allocation5 + $0xa4] ss:$16 sps:$4 sm:$0xff]   ;;  %v3613_v16 = vld [vmem:[#allocation5 + $0x48] ss:$16 sps:$4 sm:$0xff]  }
  0x64   :  { %743 = vmatpush1.bf16.msra.mxu0 %v3583_v3  ;;  %v3617_v17 = vld [vmem:[#allocation5 + $0x6c] ss:$16 sps:$4 sm:$0xff]   ;;  %v3595_v18 = vld [vmem:[#allocation5 + $0xa0] ss:$16 sps:$4 sm:$0xff]   ;;  %v3596_v19 = vld [vmem:[#allocation5 + $0xc4] ss:$16 sps:$4 sm:$0xff]  }
  0x65   :  { %744 = vmatprep.subr.bf16.mxu0 %v3584_v4  ;;  %829 = vmatpush1.bf16.msra.mxu1 %v3607_v12  ;;  %v3619_v20 = vld [vmem:[#allocation5 + $0x68] ss:$16 sps:$4 sm:$0xff]   ;;  %v3623_v21 = vld [vmem:[#allocation5 + $0x8c] ss:$16 sps:$4 sm:$0xff]   ;;  %v3598_v22 = vld [vmem:[#allocation5 + $0xc0] ss:$16 sps:$4 sm:$0xff]  }
  0x66   :  { %830 = vmatprep.subr.bf16.mxu1 %v3611_v14  ;;  %v3602_v23 = vld [vmem:[#allocation5 + $0xe4] ss:$16 sps:$4 sm:$0xff]   ;;  %v3625_v24 = vld [vmem:[#allocation5 + $0x88] ss:$16 sps:$4 sm:$0xff]   ;;  %v3629_v25 = vld [vmem:[#allocation5 + $0xac] ss:$16 sps:$4 sm:$0xff]  }
  0x67   :  { %v3604_v26 = vld [vmem:[#allocation5 + $0xe0] ss:$16 sps:$4 sm:$0xff]   ;;  %v3608_v27 = vld [vmem:[#allocation5 + $0x104] ss:$16 sps:$4 sm:$0xff]   ;;  %v3631_v28 = vld [vmem:[#allocation5 + $0xa8] ss:$16 sps:$4 sm:$0xff]  }
  0x68   :  { %745 = vmatpush1.bf16.msra.mxu0 %v3586_v5  ;;  %v3635_v29 = vld [vmem:[#allocation5 + $0xcc] ss:$16 sps:$4 sm:$0xff]   ;;  %v3610_v30 = vld [vmem:[#allocation5 + $0x100] ss:$16 sps:$4 sm:$0xff]   ;;  %v3614_v31 = vld [vmem:[#allocation5 + $0x124] ss:$16 sps:$4 sm:$0xff]  }
  0x69   :  { %746 = vmatprep.subr.bf16.mxu0 %v3587_v6  ;;  %831 = vmatpush1.bf16.msra.mxu1 %v3613_v16  ;;  %v3637_v32 = vld [vmem:[#allocation5 + $0xc8] ss:$16 sps:$4 sm:$0xff]   ;;  %v3616_v33 = vld [vmem:[#allocation5 + $0x120] ss:$16 sps:$4 sm:$0xff]   ;;  %v3641_v34 = vld [vmem:[#allocation5 + $0xec] ss:$16 sps:$4 sm:$0xff]  }
  0x6a   :  { %832 = vmatprep.subr.bf16.mxu1 %v3617_v17  ;;  %v103_v35 = vld [vmem:[#allocation2 + $0x8] sm:$0xff]  ;;  %v3620_v37 = vld [vmem:[#allocation5 + $0x144] ss:$16 sps:$4 sm:$0xff]   ;;  %v3622_v41 = vld [vmem:[#allocation5 + $0x140] ss:$16 sps:$4 sm:$0xff]   ;;  %vm736_vm0 = vcmask 130048  }
  0x6b   :  { %v107_v36 = vld [vmem:[#allocation2 + $0x28] sm:$0xff]  ;;  %v3626_v42 = vld [vmem:[#allocation5 + $0x164] ss:$16 sps:$4 sm:$0xff]   ;;  %v3628_v45 = vld [vmem:[#allocation5 + $0x160] ss:$16 sps:$4 sm:$0xff]   ;;  %vm4234_vm1 = vmmov 0  }
  0x6c   :  { %747 = vmatpush1.bf16.msra.mxu0 %v3589_v9  ;;  %v111_v38 = vpack.c.bf16 %v107_v36, %v103_v35  ;;  %v3643_v39 = vld [vmem:[#allocation5 + $0xe8] ss:$16 sps:$4 sm:$0xff]   ;;  %v3647_v40 = vld [vmem:[#allocation5 + $0x10c] ss:$16 sps:$4 sm:$0xff]   ;;  %v3632_v46 = vld [vmem:[#allocation5 + $0x184] ss:$16 sps:$4 sm:$0xff]  }
  0x6d   :  { %748 = vmatprep.subr.bf16.mxu0 %v3590_v10  ;;  %833 = vmatpush1.bf16.msra.mxu1 %v3619_v20  ;;  %v3649_v43 = vld [vmem:[#allocation5 + $0x108] ss:$16 sps:$4 sm:$0xff]   ;;  %v3653_v44 = vld [vmem:[#allocation5 + $0x12c] ss:$16 sps:$4 sm:$0xff]   ;;  %v3634_v49 = vld [vmem:[#allocation5 + $0x180] ss:$16 sps:$4 sm:$0xff]  }
  0x6e   :  { %834 = vmatprep.subr.bf16.mxu1 %v3623_v21  ;;  %772 = vmatprep.mubr.bf16.mxu0 %v111_v38  ;;  %v3655_v47 = vld [vmem:[#allocation5 + $0x128] ss:$16 sps:$4 sm:$0xff]   ;;  %v3659_v48 = vld [vmem:[#allocation5 + $0x14c] ss:$16 sps:$4 sm:$0xff]   ;;  %v3638_v50 = vld [vmem:[#allocation5 + $0x1a4] ss:$16 sps:$4 sm:$0xff]  }
  0x6f   :  { %858 = vmatprep.mubr.bf16.mxu1 %v111_v38  ;;  %v3661_v51 = vld [vmem:[#allocation5 + $0x148] ss:$16 sps:$4 sm:$0xff]   ;;  %v3665_v52 = vld [vmem:[#allocation5 + $0x16c] ss:$16 sps:$4 sm:$0xff]   ;;  %v3640_v53 = vld [vmem:[#allocation5 + $0x1a0] ss:$16 sps:$4 sm:$0xff]  }
  0x70   :  { %749 = vmatpush1.bf16.msra.mxu0 %v3592_v13  ;;  %v3644_v54 = vld [vmem:[#allocation5 + $0x1c4] ss:$16 sps:$4 sm:$0xff]   ;;  %v3667_v55 = vld [vmem:[#allocation5 + $0x168] ss:$16 sps:$4 sm:$0xff]   ;;  %v3671_v56 = vld [vmem:[#allocation5 + $0x18c] ss:$16 sps:$4 sm:$0xff]  }
  0x71   :  { %750 = vmatprep.subr.bf16.mxu0 %v3593_v15  ;;  %835 = vmatpush1.bf16.msra.mxu1 %v3625_v24  ;;  %v3646_v57 = vld [vmem:[#allocation5 + $0x1c0] ss:$16 sps:$4 sm:$0xff]   ;;  %v3650_v58 = vld [vmem:[#allocation5 + $0x1e4] ss:$16 sps:$4 sm:$0xff]   ;;  %v3673_v59 = vld [vmem:[#allocation5 + $0x188] ss:$16 sps:$4 sm:$0xff]  }
  0x72   :  { %836 = vmatprep.subr.bf16.mxu1 %v3629_v25  ;;  %v3652_v60 = vld [vmem:[#allocation5 + $0x1e0] ss:$16 sps:$4 sm:$0xff]   ;;  %v3677_v61 = vld [vmem:[#allocation5 + $0x1ac] ss:$16 sps:$4 sm:$0xff]   ;;  %v3658_v0 = vld [vmem:[#allocation5 + $0x204] ss:$16 sps:$4 sm:$0xff]  }
  0x73   :  { %v102_v62 = vld [vmem:[#allocation2] sm:$0xff]  ;;  %v105_v1 = vld [vmem:[#allocation2 + $0x18] sm:$0xff] }
  0x74   :  { %751 = vmatpush1.bf16.msra.mxu0 %v3595_v18  ;;  %v106_v63 = vld [vmem:[#allocation2 + $0x20] sm:$0xff]  ;;  %v109_v2 = vld [vmem:[#allocation2 + $0x38] sm:$0xff] }
  0x75   :  { %752 = vmatprep.subr.bf16.mxu0 %v3596_v19  ;;  %837 = vmatpush1.bf16.msra.mxu1 %v3631_v28  ;;  %v3679_v3 = vld [vmem:[#allocation5 + $0x1a8] ss:$16 sps:$4 sm:$0xff]   ;;  %v110_v4 = vpack.c.bf16 %v106_v63, %v102_v62  ;;  %v3683_v5 = vld [vmem:[#allocation5 + $0x1cc] ss:$16 sps:$4 sm:$0xff]   ;;  %v3656_v6 = vld [vmem:[#allocation5 + $0x200] ss:$16 sps:$4 sm:$0xff]   ;;  %v113_v7 = vpack.c.bf16 %v109_v2, %v105_v1 }
  0x76   :  { %838 = vmatprep.subr.bf16.mxu1 %v3635_v29  ;;  %v3664_v8 = vld [vmem:[#allocation5 + $0x224] ss:$16 sps:$4 sm:$0xff]   ;;  %v3685_v9 = vld [vmem:[#allocation5 + $0x1c8] ss:$16 sps:$4 sm:$0xff]   ;;  %v3689_v10 = vld [vmem:[#allocation5 + $0x1ec] ss:$16 sps:$4 sm:$0xff]  }
  0x77   :  { %v3662_v11 = vld [vmem:[#allocation5 + $0x220] ss:$16 sps:$4 sm:$0xff]   ;;  %v3670_v12 = vld [vmem:[#allocation5 + $0x244] ss:$16 sps:$4 sm:$0xff]   ;;  %v3691_v13 = vld [vmem:[#allocation5 + $0x1e8] ss:$16 sps:$4 sm:$0xff]  }
  0x78   :  { %753 = vmatpush1.bf16.msra.mxu0 %v3598_v22  ;;  %v3697_v14 = vld [vmem:[#allocation5 + $0x20c] ss:$16 sps:$4 sm:$0xff]   ;;  %v3668_v15 = vld [vmem:[#allocation5 + $0x240] ss:$16 sps:$4 sm:$0xff]   ;;  %v3676_v16 = vld [vmem:[#allocation5 + $0x264] ss:$16 sps:$4 sm:$0xff]  }
  0x79   :  { %754 = vmatprep.subr.bf16.mxu0 %v3602_v23  ;;  %839 = vmatpush1.bf16.msra.mxu1 %v3637_v32  ;;  %v3695_v17 = vld [vmem:[#allocation5 + $0x208] ss:$16 sps:$4 sm:$0xff]   ;;  %v3703_v18 = vld [vmem:[#allocation5 + $0x22c] ss:$16 sps:$4 sm:$0xff]   ;;  %v3674_v19 = vld [vmem:[#allocation5 + $0x260] ss:$16 sps:$4 sm:$0xff]  }
  0x7a   :  { %840 = vmatprep.subr.bf16.mxu1 %v3641_v34  ;;  %v3682_v20 = vld [vmem:[#allocation5 + $0x284] ss:$16 sps:$4 sm:$0xff]   ;;  %v3701_v21 = vld [vmem:[#allocation5 + $0x228] ss:$16 sps:$4 sm:$0xff]   ;;  %v3709_v22 = vld [vmem:[#allocation5 + $0x24c] ss:$16 sps:$4 sm:$0xff]  }
  0x7b   :  { %v3680_v23 = vld [vmem:[#allocation5 + $0x280] ss:$16 sps:$4 sm:$0xff]   ;;  %v3688_v24 = vld [vmem:[#allocation5 + $0x2a4] ss:$16 sps:$4 sm:$0xff]   ;;  %v3707_v25 = vld [vmem:[#allocation5 + $0x248] ss:$16 sps:$4 sm:$0xff]  }
  0x7c   :  { %755 = vmatpush1.bf16.msra.mxu0 %v3604_v26  ;;  %v3712_v26 = vld [vmem:[#allocation5 + $0x26c] ss:$16 sps:$4 sm:$0xff]   ;;  %v3694_v28 = vld [vmem:[#allocation5 + $0x2c4] ss:$16 sps:$4 sm:$0xff]   ;;  %v3710_v29 = vld [vmem:[#allocation5 + $0x268] ss:$16 sps:$4 sm:$0xff]  }
  0x7d   :  { %756 = vmatprep.subr.bf16.mxu0 %v3608_v27  ;;  %841 = vmatpush1.bf16.msra.mxu1 %v3643_v39  ;;  %v3686_v27 = vld [vmem:[#allocation5 + $0x2a0] ss:$16 sps:$4 sm:$0xff]   ;;  %v3700_v32 = vld [vmem:[#allocation5 + $0x2e4] ss:$16 sps:$4 sm:$0xff]   ;;  %v3718_v34 = vld [vmem:[#allocation5 + $0x2ac] ss:$16 sps:$4 sm:$0xff]  }
  0x7e   :  { %842 = vmatprep.subr.bf16.mxu1 %v3647_v40  ;;  %v3698_v35 = vld [vmem:[#allocation5 + $0x2e0] ss:$16 sps:$4 sm:$0xff]   ;;  %v3706_v36 = vld [vmem:[#allocation5 + $0x304] ss:$16 sps:$4 sm:$0xff]   ;;  %v3721_v39 = vld [vmem:[#allocation5 + $0x2cc] ss:$16 sps:$4 sm:$0xff]  }
  0x7f   :  { %v3704_v38 = vld [vmem:[#allocation5 + $0x300] ss:$16 sps:$4 sm:$0xff]   ;;  %v3760_v63 = vld [vmem:[#allocation7 + $0xa4] ss:$16 sps:$4 sm:$0xff]   ;;  %v3751_v1 = vld [vmem:[#allocation7 + $0x6c] ss:$16 sps:$4 sm:$0xff]  }
  0x80   :  { %757 = vmatpush1.bf16.msra.mxu0 %v3610_v30  ;;  %v3715_v30 = vld [vmem:[#allocation5 + $0x28c] ss:$16 sps:$4 sm:$0xff]   ;;  %v104_v40 = vld [vmem:[#allocation2 + $0x10] sm:$0xff] }
  0x81   :  { %758 = vmatprep.subr.bf16.mxu0 %v3614_v31  ;;  %843 = vmatpush1.bf16.msra.mxu1 %v3649_v43  ;;  %v3692_v31 = vld [vmem:[#allocation5 + $0x2c0] ss:$16 sps:$4 sm:$0xff]   ;;  %v3719_v43 = vld [vmem:[#allocation5 + $0x2c8] ss:$16 sps:$4 sm:$0xff]  }
  0x82   :  { %844 = vmatprep.subr.bf16.mxu1 %v3653_v44  ;;  %v3752_v62 = vld [vmem:[#allocation7 + $0x80] ss:$16 sps:$4 sm:$0xff]  }
  0x83   :  { %v3758_v2 = vld [vmem:[#allocation7 + $0xa0] ss:$16 sps:$4 sm:$0xff]  }
  0x84   :  { %759 = vmatpush1.bf16.msra.mxu0 %v3616_v33  ;;  %v3713_v33 = vld [vmem:[#allocation5 + $0x288] ss:$16 sps:$4 sm:$0xff]  }
  0x85   :  { %760 = vmatprep.subr.bf16.mxu0 %v3620_v37  ;;  %845 = vmatpush1.bf16.msra.mxu1 %v3655_v47  ;;  %v3716_v37 = vld [vmem:[#allocation5 + $0x2a8] ss:$16 sps:$4 sm:$0xff]   ;;  %v3736_v47 = vld [vmem:[#allocation7 + $0x24] ss:$16 sps:$4 sm:$0xff]  }
  0x86   :  { %846 = vmatprep.subr.bf16.mxu1 %v3659_v48  ;;  %v3722_v48 = vld [vmem:[#allocation5 + $0x2e8] ss:$16 sps:$4 sm:$0xff]  }
  0x88   :  { %761 = vmatpush1.bf16.msra.mxu0 %v3622_v41  ;;  %v108_v41 = vld [vmem:[#allocation2 + $0x30] sm:$0xff] }
  0x89   :  { %762 = vmatprep.subr.bf16.mxu0 %v3626_v42  ;;  %847 = vmatpush1.bf16.msra.mxu1 %v3661_v51  ;;  %v3730_v42 = vld [vmem:[#allocation7 + $0x4] ss:$16 sps:$4 sm:$0xff]   ;;  %v112_v44 = vpack.c.bf16 %v108_v41, %v104_v40  ;;  %v3817_v41 = vld [vmem:[#allocation7 + $0x1cc] ss:$16 sps:$4 sm:$0xff]  }
  0x8a   :  { %848 = vmatprep.subr.bf16.mxu1 %v3665_v52  ;;  %v3742_v51 = vld [vmem:[#allocation7 + $0x44] ss:$16 sps:$4 sm:$0xff]   ;;  %v3725_v52 = vld [vmem:[#allocation5 + $0x308] ss:$16 sps:$4 sm:$0xff]  }
  0x8b   :  { %v3814_v40 = vld [vmem:[#allocation7 + $0x1c4] ss:$16 sps:$4 sm:$0xff]  }
  0x8c   :  { %763 = vmatpush1.bf16.msra.mxu0 %v3628_v45  ;;  %v3724_v45 = vld [vmem:[#allocation5 + $0x2ec] ss:$16 sps:$4 sm:$0xff]  }
  0x8d   :  { %764 = vmatprep.subr.bf16.mxu0 %v3632_v46  ;;  %849 = vmatpush1.bf16.msra.mxu1 %v3667_v55  ;;  %v3728_v46 = vld [vmem:[#allocation7] ss:$16 sps:$4 sm:$0xff]   ;;  %v3748_v55 = vld [vmem:[#allocation7 + $0x64] ss:$16 sps:$4 sm:$0xff]  }
  0x8e   :  { %850 = vmatprep.subr.bf16.mxu1 %v3671_v56  ;;  %v3731_v56 = vld [vmem:[#allocation7 + $0x8] ss:$16 sps:$4 sm:$0xff]  }
  0x90   :  { %765 = vmatpush1.bf16.msra.mxu0 %v3634_v49  ;;  %v3727_v49 = vld [vmem:[#allocation5 + $0x30c] ss:$16 sps:$4 sm:$0xff]  }
  0x91   :  { %766 = vmatprep.subr.bf16.mxu0 %v3638_v50  ;;  %851 = vmatpush1.bf16.msra.mxu1 %v3673_v59  ;;  %v3734_v50 = vld [vmem:[#allocation7 + $0x20] ss:$16 sps:$4 sm:$0xff]   ;;  %v3754_v59 = vld [vmem:[#allocation7 + $0x84] ss:$16 sps:$4 sm:$0xff]  }
  0x92   :  { %852 = vmatprep.subr.bf16.mxu1 %v3677_v61  ;;  %v3745_v61 = vld [vmem:[#allocation7 + $0x4c] ss:$16 sps:$4 sm:$0xff]  }
  0x94   :  { %767 = vmatpush1.bf16.msra.mxu0 %v3640_v53  ;;  %v3733_v53 = vld [vmem:[#allocation7 + $0xc] ss:$16 sps:$4 sm:$0xff]  }
  0x95   :  { %768 = vmatprep.subr.bf16.mxu0 %v3644_v54  ;;  %853 = vmatpush1.bf16.msra.mxu1 %v3679_v3  ;;  %v3740_v54 = vld [vmem:[#allocation7 + $0x40] ss:$16 sps:$4 sm:$0xff]   ;;  %v3766_v3 = vld [vmem:[#allocation7 + $0xc4] ss:$16 sps:$4 sm:$0xff]  }
  0x96   :  { %854 = vmatprep.subr.bf16.mxu1 %v3683_v5  ;;  %v3757_v5 = vld [vmem:[#allocation7 + $0x8c] ss:$16 sps:$4 sm:$0xff]  }
  0x98   :  { %769 = vmatpush1.bf16.msra.mxu0 %v3646_v57  ;;  %v3739_v57 = vld [vmem:[#allocation7 + $0x2c] ss:$16 sps:$4 sm:$0xff]  }
  0x99   :  { %770 = vmatprep.subr.bf16.mxu0 %v3650_v58  ;;  %855 = vmatpush1.bf16.msra.mxu1 %v3685_v9  ;;  %v3746_v58 = vld [vmem:[#allocation7 + $0x60] ss:$16 sps:$4 sm:$0xff]   ;;  %v3763_v9 = vld [vmem:[#allocation7 + $0xac] ss:$16 sps:$4 sm:$0xff]  }
  0x9a   :  { %856 = vmatprep.subr.bf16.mxu1 %v3689_v10  ;;  %v3770_v10 = vld [vmem:[#allocation7 + $0xe0] ss:$16 sps:$4 sm:$0xff]  }
  0x9c   :  { %771 = vmatpush1.bf16.msra.mxu0 %v3652_v60  ;;  %v3737_v60 = vld [vmem:[#allocation7 + $0x28] ss:$16 sps:$4 sm:$0xff]  }
  0x9d   :  { %783 = vmatprep.subr.bf16.mxu0 %v3658_v0  ;;  %857 = vmatpush1.bf16.msra.mxu1 %v3691_v13  ;;  %v3743_v0 = vld [vmem:[#allocation7 + $0x48] ss:$16 sps:$4 sm:$0xff]   ;;  %v3769_v13 = vld [vmem:[#allocation7 + $0xcc] ss:$16 sps:$4 sm:$0xff]  }
  0x9e   :  { %869 = vmatprep.subr.bf16.mxu1 %v3697_v14  ;;  %v3776_v14 = vld [vmem:[#allocation7 + $0x100] ss:$16 sps:$4 sm:$0xff]  }
  0x9f   :  { %773 = vmatmul.mubr.bf16.vlgmr.msra.gmra.mrb[0].mxu0 %v110_v4 }
  0xa0   :  { %784 = vmatpush1.bf16.msra.mxu0 %v3656_v6  ;;  %3167 = vmatprep.mubr.msk.bf16.mxu0 %vm736_vm0, %v113_v7  ;;  %v3764_v6 = vld [vmem:[#allocation7 + $0xc0] ss:$16 sps:$4 sm:$0xff]  }
  0xa1   :  { %785 = vmatprep.subr.bf16.mxu0 %v3664_v8  ;;  %859 = vmatmul.mubr.bf16.vlgmr.msra.gmra.mrb[0].mxu1 %v110_v4  ;;  %v3749_v4 = vld [vmem:[#allocation7 + $0x68] ss:$16 sps:$4 sm:$0xff]  }
  0xa2   :  { %870 = vmatpush1.bf16.msra.mxu1 %v3695_v17  ;;  %3168 = vmatprep.mubr.msk.bf16.mxu1 %vm736_vm0, %v113_v7  ;;  %v3772_v7 = vld [vmem:[#allocation7 + $0xe4] ss:$16 sps:$4 sm:$0xff]   ;;  %v3755_v8 = vld [vmem:[#allocation7 + $0x88] ss:$16 sps:$4 sm:$0xff]   ;;  %v3775_v17 = vld [vmem:[#allocation7 + $0xec] ss:$16 sps:$4 sm:$0xff]  }
  0xa3   :  { %871 = vmatprep.subr.bf16.mxu1 %v3703_v18  ;;  %v3782_v18 = vld [vmem:[#allocation7 + $0x120] ss:$16 sps:$4 sm:$0xff]  }
  0xa4   :  { %786 = vmatpush1.bf16.msra.mxu0 %v3662_v11  ;;  %v3778_v11 = vld [vmem:[#allocation7 + $0x104] ss:$16 sps:$4 sm:$0xff]  }
  0xa5   :  { %787 = vmatprep.subr.bf16.mxu0 %v3670_v12  ;;  %v3761_v12 = vld [vmem:[#allocation7 + $0xa8] ss:$16 sps:$4 sm:$0xff]  }
  0xa6   :  { %872 = vmatpush1.bf16.msra.mxu1 %v3701_v21  ;;  %v3781_v21 = vld [vmem:[#allocation7 + $0x10c] ss:$16 sps:$4 sm:$0xff]  }
  0xa7   :  { %873 = vmatprep.subr.bf16.mxu1 %v3709_v22  ;;  %v3788_v22 = vld [vmem:[#allocation7 + $0x140] ss:$16 sps:$4 sm:$0xff]  }
  0xa8   :  { %788 = vmatpush1.bf16.msra.mxu0 %v3668_v15  ;;  %v3784_v15 = vld [vmem:[#allocation7 + $0x124] ss:$16 sps:$4 sm:$0xff]  }
  0xa9   :  { %789 = vmatprep.subr.bf16.mxu0 %v3676_v16  ;;  %v3767_v16 = vld [vmem:[#allocation7 + $0xc8] ss:$16 sps:$4 sm:$0xff]  }
  0xaa   :  { %874 = vmatpush1.bf16.msra.mxu1 %v3707_v25  ;;  %v3787_v25 = vld [vmem:[#allocation7 + $0x12c] ss:$16 sps:$4 sm:$0xff]  }
  0xab   :  { %875 = vmatprep.subr.bf16.mxu1 %v3712_v26  ;;  %v3794_v26 = vld [vmem:[#allocation7 + $0x160] ss:$16 sps:$4 sm:$0xff]  }
  0xac   :  { %790 = vmatpush1.bf16.msra.mxu0 %v3674_v19  ;;  %v3790_v19 = vld [vmem:[#allocation7 + $0x144] ss:$16 sps:$4 sm:$0xff]  }
  0xad   :  { %791 = vmatprep.subr.bf16.mxu0 %v3682_v20  ;;  %v3773_v20 = vld [vmem:[#allocation7 + $0xe8] ss:$16 sps:$4 sm:$0xff]  }
  0xae   :  { %876 = vmatpush1.bf16.msra.mxu1 %v3710_v29  ;;  %v3793_v29 = vld [vmem:[#allocation7 + $0x14c] ss:$16 sps:$4 sm:$0xff]  }
  0xaf   :  { %877 = vmatprep.subr.bf16.mxu1 %v3715_v30  ;;  %v3800_v30 = vld [vmem:[#allocation7 + $0x180] ss:$16 sps:$4 sm:$0xff]  }
  0xb0   :  { %792 = vmatpush1.bf16.msra.mxu0 %v3680_v23  ;;  %v3796_v23 = vld [vmem:[#allocation7 + $0x164] ss:$16 sps:$4 sm:$0xff]  }
  0xb1   :  { %793 = vmatprep.subr.bf16.mxu0 %v3688_v24  ;;  %v3779_v24 = vld [vmem:[#allocation7 + $0x108] ss:$16 sps:$4 sm:$0xff]  }
  0xb2   :  { %878 = vmatpush1.bf16.msra.mxu1 %v3713_v33  ;;  %v3799_v33 = vld [vmem:[#allocation7 + $0x16c] ss:$16 sps:$4 sm:$0xff]  }
  0xb3   :  { %879 = vmatprep.subr.bf16.mxu1 %v3718_v34  ;;  %v3806_v34 = vld [vmem:[#allocation7 + $0x1a0] ss:$16 sps:$4 sm:$0xff]  }
  0xb4   :  { %794 = vmatpush1.bf16.msra.mxu0 %v3686_v27  ;;  %v3802_v27 = vld [vmem:[#allocation7 + $0x184] ss:$16 sps:$4 sm:$0xff]  }
  0xb5   :  { %795 = vmatprep.subr.bf16.mxu0 %v3694_v28  ;;  %v3785_v28 = vld [vmem:[#allocation7 + $0x128] ss:$16 sps:$4 sm:$0xff]  }
  0xb6   :  { %880 = vmatpush1.bf16.msra.mxu1 %v3716_v37  ;;  %v3803_v37 = vld [vmem:[#allocation7 + $0x188] ss:$16 sps:$4 sm:$0xff]  }
  0xb7   :  { %881 = vmatprep.subr.bf16.mxu1 %v3721_v39  ;;  %v3809_v39 = vld [vmem:[#allocation7 + $0x1a8] ss:$16 sps:$4 sm:$0xff]  }
  0xb8   :  { %796 = vmatpush1.bf16.msra.mxu0 %v3692_v31  ;;  %v3808_v31 = vld [vmem:[#allocation7 + $0x1a4] ss:$16 sps:$4 sm:$0xff]  }
  0xb9   :  { %797 = vmatprep.subr.bf16.mxu0 %v3700_v32  ;;  %v3791_v32 = vld [vmem:[#allocation7 + $0x148] ss:$16 sps:$4 sm:$0xff]  }
  0xba   :  { %882 = vmatpush1.bf16.msra.mxu1 %v3719_v43  ;;  %v3815_v43 = vld [vmem:[#allocation7 + $0x1c8] ss:$16 sps:$4 sm:$0xff]  }
  0xbb   :  { %883 = vmatprep.subr.bf16.mxu1 %v3724_v45  ;;  %v3823_v45 = vld [vmem:[#allocation7 + $0x1ec] ss:$16 sps:$4 sm:$0xff]  }
  0xbc   :  { %798 = vmatpush1.bf16.msra.mxu0 %v3698_v35  ;;  %v3797_v35 = vld [vmem:[#allocation7 + $0x168] ss:$16 sps:$4 sm:$0xff]  }
  0xbd   :  { %799 = vmatprep.subr.bf16.mxu0 %v3706_v36  ;;  %v3805_v36 = vld [vmem:[#allocation7 + $0x18c] ss:$16 sps:$4 sm:$0xff]  }
  0xbe   :  { %884 = vmatpush1.bf16.msra.mxu1 %v3722_v48  ;;  %v3826_v48 = vld [vmem:[#allocation7 + $0x204] ss:$16 sps:$4 sm:$0xff]  }
  0xbf   :  { %885 = vmatprep.subr.bf16.mxu1 %v3727_v49  ;;  %v3829_v49 = vld [vmem:[#allocation7 + $0x20c] ss:$16 sps:$4 sm:$0xff]  }
  0xc0   :  { %800 = vmatpush1.bf16.msra.mxu0 %v3704_v38  ;;  %v3811_v38 = vld [vmem:[#allocation7 + $0x1ac] ss:$16 sps:$4 sm:$0xff]  }
  0xc1   :  { %1714 = vmatprep.subr.bf16.mxu0 %v3730_v42  ;;  %v3812_v42 = vld [vmem:[#allocation7 + $0x1c0] ss:$16 sps:$4 sm:$0xff]  }
  0xc2   :  { %886 = vmatpush1.bf16.msra.mxu1 %v3725_v52 }
  0xc3   :  { %816 = vmatmul.mubr.bf16.vlgmr.msra.gmra.mrb[0].mxu0 %v112_v44  ;;  %1800 = vmatprep.subr.bf16.mxu1 %v3733_v53  ;;  %v214_v53 = vld [vmem:[%s4430_s2] sm:$0xf] }
  0xc4   :  { %1715 = vmatpush1.bf16.msra.mxu0 %v3728_v46  ;;  %v3818_v46 = vld [vmem:[#allocation7 + $0x1e0] ss:$16 sps:$4 sm:$0xff]  }
  0xc5   :  { %1716 = vmatprep.subr.bf16.mxu0 %v3736_v47  ;;  %902 = vmatmul.mubr.bf16.vlgmr.msra.gmra.mrb[0].mxu1 %v112_v44  ;;  %v3820_v44 = vld [vmem:[#allocation7 + $0x1e4] ss:$16 sps:$4 sm:$0xff]   ;;  %v3821_v47 = vld [vmem:[#allocation7 + $0x1e8] ss:$16 sps:$4 sm:$0xff]  }
  0xc6   :  { %1801 = vmatpush1.bf16.msra.mxu1 %v3731_v56 }
  0xc7   :  { %1802 = vmatprep.subr.bf16.mxu1 %v3739_v57 }
  0xc8   :  { %1717 = vmatpush1.bf16.msra.mxu0 %v3734_v50  ;;  %v216_v50 = vlaneseq }
  0xc9   :  { %1718 = vmatprep.subr.bf16.mxu0 %v3742_v51 }
  0xca   :  { %1803 = vmatpush1.bf16.msra.mxu1 %v3737_v60  ;;  %v4358_v51 = vshrl.u32 %v216_v50, 7 }
  0xcb   :  { %1804 = vmatprep.subr.bf16.mxu1 %v3745_v61 }
  0xcc   :  { %1719 = vmatpush1.bf16.msra.mxu0 %v3740_v54  ;;  %v4361_v52 = vsub.s32 0, %v4358_v51  ;;  %v4367_v54 = vsub.s32 1, %v4358_v51 }
  0xcd   :  { %1720 = vmatprep.subr.bf16.mxu0 %v3748_v55 }
  0xce   :  { %1805 = vmatpush1.bf16.msra.mxu1 %v3743_v0  ;;  %v219_v55 = vrot.slane %v214_v53, %v4361_v52  ;;  %v223_v56 = vrot.slane %v214_v53, %v4367_v54  ;;  %v4372_v0 = vsub.s32 2, %v4358_v51 }
  0xcf   :  { %1806 = vmatprep.subr.bf16.mxu1 %v3751_v1 }
  0xd0   :  { %1721 = vmatpush1.bf16.msra.mxu0 %v3746_v58 }
  0xd1   :  { %1722 = vmatprep.subr.bf16.mxu0 %v3754_v59 }
  0xd2   :  { %1807 = vmatpush1.bf16.msra.mxu1 %v3749_v4 }
  0xd3   :  { %1808 = vmatprep.subr.bf16.mxu1 %v3757_v5 }
  0xd4   :  { %1723 = vmatpush1.bf16.msra.mxu0 %v3752_v62 }
  0xd5   :  { %1724 = vmatprep.subr.bf16.mxu0 %v3760_v63 }
  0xd6   :  { %1809 = vmatpush1.bf16.msra.mxu1 %v3755_v8  ;;  %v227_v8 = vrot.slane %v214_v53, %v4372_v0 }
  0xd7   :  { %1810 = vmatprep.subr.bf16.mxu1 %v3763_v9 }
  0xd8   :  { %1725 = vmatpush1.bf16.msra.mxu0 %v3758_v2  ;;  %v230_v2 = vsub.s32 3, %v4358_v51 }
  0xd9   :  { %1726 = vmatprep.subr.bf16.mxu0 %v3766_v3 }
  0xda   :  { %1811 = vmatpush1.bf16.msra.mxu1 %v3761_v12  ;;  %v231_v12 = vrot.slane %v214_v53, %v230_v2  ;;  %v3863_v53 = vld [vmem:[#allocation7 + $0x2c8] ss:$16 sps:$4 sm:$0xff]  }
  0xdb   :  { %1812 = vmatprep.subr.bf16.mxu1 %v3769_v13  ;;  %v3832_v13 = vld [vmem:[#allocation7 + $0x224] ss:$16 sps:$4 sm:$0xff]  }
  0xdc   :  { %1727 = vmatpush1.bf16.msra.mxu0 %v3764_v6 }
  0xdd   :  { %1728 = vmatprep.subr.bf16.mxu0 %v3772_v7 }
  0xde   :  { %1813 = vmatpush1.bf16.msra.mxu1 %v3767_v16 }
  0xdf   :  { %1814 = vmatprep.subr.bf16.mxu1 %v3775_v17 }
  0xe0   :  { %1729 = vmatpush1.bf16.msra.mxu0 %v3770_v10  ;;  %v3824_v10 = vld [vmem:[#allocation7 + $0x200] ss:$16 sps:$4 sm:$0xff]  }
  0xe1   :  { %1730 = vmatprep.subr.bf16.mxu0 %v3778_v11  ;;  %v3827_v11 = vld [vmem:[#allocation7 + $0x208] ss:$16 sps:$4 sm:$0xff]  }
  0xe2   :  { %1815 = vmatpush1.bf16.msra.mxu1 %v3773_v20 }
  0xe3   :  { %1816 = vmatprep.subr.bf16.mxu1 %v3781_v21 }
  0xe4   :  { %1731 = vmatpush1.bf16.msra.mxu0 %v3776_v14  ;;  %v3835_v14 = vld [vmem:[#allocation7 + $0x22c] ss:$16 sps:$4 sm:$0xff]  }
  0xe5   :  { %1732 = vmatprep.subr.bf16.mxu0 %v3784_v15 }
  0xe6   :  { %1817 = vmatpush1.bf16.msra.mxu1 %v3779_v24 }
  0xe7   :  { %1818 = vmatprep.subr.bf16.mxu1 %v3787_v25 }
  0xe8   :  { %1733 = vmatpush1.bf16.msra.mxu0 %v3782_v18  ;;  %v3830_v18 = vld [vmem:[#allocation7 + $0x220] ss:$16 sps:$4 sm:$0xff]  }
  0xe9   :  { %1734 = vmatprep.subr.bf16.mxu0 %v3790_v19  ;;  %v3833_v19 = vld [vmem:[#allocation7 + $0x228] ss:$16 sps:$4 sm:$0xff]  }
  0xea   :  { %1819 = vmatpush1.bf16.msra.mxu1 %v3785_v28 }
  0xeb   :  { %1820 = vmatprep.subr.bf16.mxu1 %v3793_v29 }
  0xec   :  { %1735 = vmatpush1.bf16.msra.mxu0 %v3788_v22  ;;  %v3838_v22 = vld [vmem:[#allocation7 + $0x244] ss:$16 sps:$4 sm:$0xff]  }
  0xed   :  { %1736 = vmatprep.subr.bf16.mxu0 %v3796_v23  ;;  %v3841_v23 = vld [vmem:[#allocation7 + $0x24c] ss:$16 sps:$4 sm:$0xff]  }
  0xee   :  { %1821 = vmatpush1.bf16.msra.mxu1 %v3791_v32 }
  0xef   :  { %1822 = vmatprep.subr.bf16.mxu1 %v3799_v33  ;;  %v3844_v33 = vld [vmem:[#allocation7 + $0x264] ss:$16 sps:$4 sm:$0xff]  }
  0xf0   :  { %1737 = vmatpush1.bf16.msra.mxu0 %v3794_v26 }
  0xf1   :  { %1738 = vmatprep.subr.bf16.mxu0 %v3802_v27 }
  0xf2   :  { %1823 = vmatpush1.bf16.msra.mxu1 %v3797_v35 }
  0xf3   :  { %1824 = vmatprep.subr.bf16.mxu1 %v3805_v36 }
  0xf4   :  { %1739 = vmatpush1.bf16.msra.mxu0 %v3800_v30  ;;  %v3836_v30 = vld [vmem:[#allocation7 + $0x240] ss:$16 sps:$4 sm:$0xff]  }
  0xf5   :  { %1740 = vmatprep.subr.bf16.mxu0 %v3808_v31  ;;  %v3839_v31 = vld [vmem:[#allocation7 + $0x248] ss:$16 sps:$4 sm:$0xff]  }
  0xf6   :  { %1825 = vmatpush1.bf16.msra.mxu1 %v3803_v37  ;;  %v3842_v37 = vld [vmem:[#allocation7 + $0x260] ss:$16 sps:$4 sm:$0xff]  }
  0xf7   :  { %1826 = vmatprep.subr.bf16.mxu1 %v3811_v38  ;;  %v3845_v38 = vld [vmem:[#allocation7 + $0x268] ss:$16 sps:$4 sm:$0xff]  }
  0xf8   :  { %1741 = vmatpush1.bf16.msra.mxu0 %v3806_v34  ;;  %v3847_v34 = vld [vmem:[#allocation7 + $0x26c] ss:$16 sps:$4 sm:$0xff]  }
  0xf9   :  { %1742 = vmatprep.subr.bf16.mxu0 %v3814_v40  ;;  %v3853_v40 = vld [vmem:[#allocation7 + $0x28c] ss:$16 sps:$4 sm:$0xff]  }
  0xfa   :  { %1827 = vmatpush1.bf16.msra.mxu1 %v3809_v39  ;;  %v3850_v39 = vld [vmem:[#allocation7 + $0x284] ss:$16 sps:$4 sm:$0xff]  }
  0xfb   :  { %1828 = vmatprep.subr.bf16.mxu1 %v3817_v41  ;;  %v3848_v41 = vld [vmem:[#allocation7 + $0x280] ss:$16 sps:$4 sm:$0xff]  }
  0xfc   :  { %1743 = vmatpush1.bf16.msra.mxu0 %v3812_v42  ;;  %v3851_v42 = vld [vmem:[#allocation7 + $0x288] ss:$16 sps:$4 sm:$0xff]  }
  0xfd   :  { %1744 = vmatprep.subr.bf16.mxu0 %v3820_v44  ;;  %v3859_v44 = vld [vmem:[#allocation7 + $0x2ac] ss:$16 sps:$4 sm:$0xff]  }
  0xfe   :  { %1829 = vmatpush1.bf16.msra.mxu1 %v3815_v43  ;;  %v3856_v43 = vld [vmem:[#allocation7 + $0x2a4] ss:$16 sps:$4 sm:$0xff]  }
  0xff   :  { %1830 = vmatprep.subr.bf16.mxu1 %v3823_v45  ;;  %v3854_v45 = vld [vmem:[#allocation7 + $0x2a0] ss:$16 sps:$4 sm:$0xff]  }
 0x100   :  { %1745 = vmatpush1.bf16.msra.mxu0 %v3818_v46  ;;  %v3857_v46 = vld [vmem:[#allocation7 + $0x2a8] ss:$16 sps:$4 sm:$0xff]  }
 0x101   :  { %1757 = vmatprep.subr.bf16.mxu0 %v3826_v48  ;;  %v3865_v48 = vld [vmem:[#allocation7 + $0x2cc] ss:$16 sps:$4 sm:$0xff]  }
 0x102   :  { %1831 = vmatpush1.bf16.msra.mxu1 %v3821_v47  ;;  %v3862_v47 = vld [vmem:[#allocation7 + $0x2c4] ss:$16 sps:$4 sm:$0xff]  }
 0x103   :  { %1843 = vmatprep.subr.bf16.mxu1 %v3829_v49  ;;  %v3860_v49 = vld [vmem:[#allocation7 + $0x2c0] ss:$16 sps:$4 sm:$0xff]  }
 0x196   :  { %v817_v57 = vpop.f32.mrb[0].mxu0 }
 0x197   :  { %v3522_v58 = vadd.f32 %v817_v57, %v219_v55  ;;  %v819_v59 = vpop.f32.mrb[1].mxu0  ;;  %v3866_v57 = vld [vmem:[#allocation7 + $0x2e0] ss:$16 sps:$4 sm:$0xff]  }
 0x198   :  { %v3523_v60 = vadd.f32 %v819_v59, %v223_v56  ;;  %v821_v61 = vpop.f32.mrb[2].mxu0  ;;  %v903_v15 = vpop.f32.mrb[0].mxu1  ;;  %v3874_v59 = vld [vmem:[#allocation7 + $0x304] ss:$16 sps:$4 sm:$0xff]  }
 0x199   :  { %v3524_v62 = vadd.f32 %v821_v61, %v219_v55  ;;  %v823_v63 = vpop.f32.mrb[3].mxu0  ;;  %v912_v3 = vmax.f32 %v3522_v58, 0.0  ;;  %v3526_v16 = vadd.f32 %v903_v15, %v227_v8  ;;  %v905_v17 = vpop.f32.mrb[1].mxu1  ;;  %v3868_v55 = vld [vmem:[#allocation7 + $0x2e4] ss:$16 sps:$4 sm:$0xff]  }
 0x19a   :  { %v3525_v1 = vadd.f32 %v823_v63, %v223_v56  ;;  %v913_v5 = vmax.f32 %v3523_v60, 0.0  ;;  %v3527_v20 = vadd.f32 %v905_v17, %v231_v12  ;;  %v907_v21 = vpop.f32.mrb[2].mxu1  ;;  %v3871_v56 = vld [vmem:[#allocation7 + $0x2ec] ss:$16 sps:$4 sm:$0xff]   ;;  %v3869_v58 = vld [vmem:[#allocation7 + $0x2e8] ss:$16 sps:$4 sm:$0xff]  }
 0x19b   :  { %v916_v4 = vmax.f32 %v3524_v62, 0.0  ;;  %v914_v24 = vmax.f32 %v3526_v16, 0.0  ;;  %v3528_v25 = vadd.f32 %v907_v21, %v227_v8  ;;  %v909_v26 = vpop.f32.mrb[3].mxu1  ;;  %v3877_v60 = vld [vmem:[#allocation7 + $0x30c] ss:$16 sps:$4 sm:$0xff]  }
 0x19c   :  { %v917_v6 = vmax.f32 %v3525_v1, 0.0  ;;  %v915_v27 = vmax.f32 %v3527_v20, 0.0  ;;  %v3529_v28 = vadd.f32 %v909_v26, %v231_v12  ;;  %v3872_v61 = vld [vmem:[#allocation7 + $0x300] ss:$16 sps:$4 sm:$0xff]   ;;  %v3875_v62 = vld [vmem:[#allocation7 + $0x308] ss:$16 sps:$4 sm:$0xff]  }
 0x19d   :  { %v920_v7 = vpack.c.bf16 %v916_v4, %v912_v3  ;;  %v918_v29 = vmax.f32 %v3528_v25, 0.0  ;;  %v3880_v63 = vld [vmem:[#allocation7 + $0x324] ss:$16 sps:$4 sm:$0xff]   ;;  %v3883_v1 = vld [vmem:[#allocation7 + $0x32c] ss:$16 sps:$4 sm:$0xff]  }
 0x19e   :  { %v921_v9 = vpack.c.bf16 %v917_v6, %v913_v5  ;;  %v919_v32 = vmax.f32 %v3529_v28, 0.0  ;;  %v3878_v3 = vld [vmem:[#allocation7 + $0x320] ss:$16 sps:$4 sm:$0xff]   ;;  %v3881_v4 = vld [vmem:[#allocation7 + $0x328] ss:$16 sps:$4 sm:$0xff]  }
 0x19f   :  { %v4378_v35 = vpack.c.bf16 %v918_v29, %v914_v24  ;;  %v3886_v5 = vld [vmem:[#allocation7 + $0x344] ss:$16 sps:$4 sm:$0xff]   ;;  %v3889_v6 = vld [vmem:[#allocation7 + $0x34c] ss:$16 sps:$4 sm:$0xff]   ;;  %v3887_v8 = vld [vmem:[#allocation7 + $0x348] ss:$16 sps:$4 sm:$0xff]  }
 0x1a0   :  { %1746 = vmatprep.mubr.bf16.mxu0 %v921_v9  ;;  %1832 = vmatprep.mubr.bf16.mxu1 %v921_v9  ;;  %v923_v36 = vpack.c.bf16 %v919_v32, %v915_v27  ;;  %v3892_v9 = vld [vmem:[#allocation7 + $0x364] ss:$16 sps:$4 sm:$0xff]   ;;  %v3893_v12 = vld [vmem:[#allocation7 + $0x368] ss:$16 sps:$4 sm:$0xff]   ;;  %v3896_v15 = vld [vmem:[#allocation7 + $0x380] ss:$16 sps:$4 sm:$0xff]  }
 0x1a1   :  { %1747 = vmatmul.mubr.bf16.vlgmr.msra.gmra.mrb[4].mxu0 %v920_v7  ;;  %1833 = vmatmul.mubr.bf16.vlgmr.msra.gmra.mrb[4].mxu1 %v920_v7  ;;  %v3884_v7 = vld [vmem:[#allocation7 + $0x340] ss:$16 sps:$4 sm:$0xff]   ;;  %v3899_v16 = vld [vmem:[#allocation7 + $0x388] ss:$16 sps:$4 sm:$0xff]   ;;  %v3904_v17 = vld [vmem:[#allocation7 + $0x3a4] ss:$16 sps:$4 sm:$0xff]  }
 0x1a2   :  { %1758 = vmatpush1.bf16.msra.mxu0 %v3824_v10  ;;  %1844 = vmatpush1.bf16.msra.mxu1 %v3827_v11  ;;  %v3895_v10 = vld [vmem:[#allocation7 + $0x36c] ss:$16 sps:$4 sm:$0xff]   ;;  %v3890_v11 = vld [vmem:[#allocation7 + $0x360] ss:$16 sps:$4 sm:$0xff]   ;;  %v3905_v20 = vld [vmem:[#allocation7 + $0x3a8] ss:$16 sps:$4 sm:$0xff]  }
 0x1a3   :  { %1759 = vmatprep.subr.bf16.mxu0 %v3832_v13  ;;  %1845 = vmatprep.subr.bf16.mxu1 %v3835_v14  ;;  %v3898_v13 = vld [vmem:[#allocation7 + $0x384] ss:$16 sps:$4 sm:$0xff]   ;;  %v3901_v14 = vld [vmem:[#allocation7 + $0x38c] ss:$16 sps:$4 sm:$0xff]   ;;  %v3911_v24 = vld [vmem:[#allocation7 + $0x3c8] ss:$16 sps:$4 sm:$0xff]  }
 0x1a4   :  { %1789 = vmatprep.mubr.bf16.mxu0 %v923_v36  ;;  %1875 = vmatprep.mubr.bf16.mxu1 %v923_v36  ;;  %v3910_v21 = vld [vmem:[#allocation7 + $0x3c4] ss:$16 sps:$4 sm:$0xff]   ;;  %v3919_v26 = vld [vmem:[#allocation7 + $0x3ec] ss:$16 sps:$4 sm:$0xff]   ;;  %v3914_v27 = vld [vmem:[#allocation7 + $0x3e0] ss:$16 sps:$4 sm:$0xff]  }
 0x1a5   :  { %v3916_v25 = vld [vmem:[#allocation7 + $0x3e4] ss:$16 sps:$4 sm:$0xff]   ;;  %v3917_v28 = vld [vmem:[#allocation7 + $0x3e8] ss:$16 sps:$4 sm:$0xff]  }
 0x1a6   :  { %1760 = vmatpush1.bf16.msra.mxu0 %v3830_v18  ;;  %1846 = vmatpush1.bf16.msra.mxu1 %v3833_v19  ;;  %v3907_v18 = vld [vmem:[#allocation7 + $0x3ac] ss:$16 sps:$4 sm:$0xff]   ;;  %v3902_v19 = vld [vmem:[#allocation7 + $0x3a0] ss:$16 sps:$4 sm:$0xff]   ;;  %v3948_v32 = vld [vmem:[#allocation8 + $0x8] ss:$12 sps:$4 sm:$0xff]  }
 0x1a7   :  { %1761 = vmatprep.subr.bf16.mxu0 %v3838_v22  ;;  %1847 = vmatprep.subr.bf16.mxu1 %v3841_v23  ;;  %v3913_v22 = vld [vmem:[#allocation7 + $0x3cc] ss:$16 sps:$4 sm:$0xff]   ;;  %v3908_v23 = vld [vmem:[#allocation7 + $0x3c0] ss:$16 sps:$4 sm:$0xff]   ;;  %v3923_v36 = vld [vmem:[#allocation8 + $0x18] ss:$12 sps:$4 sm:$0xff]  }
 0x1a8   :  { %v3922_v29 = vld [vmem:[#allocation8 + $0x4] ss:$12 sps:$4 sm:$0xff]  }
 0x1aa   :  { %1762 = vmatpush1.bf16.msra.mxu0 %v3836_v30  ;;  %1848 = vmatpush1.bf16.msra.mxu1 %v3839_v31  ;;  %v3947_v30 = vld [vmem:[#allocation8 + $0xc8] ss:$12 sps:$4 sm:$0xff]   ;;  %v3920_v31 = vld [vmem:[#allocation8] ss:$12 sps:$4 sm:$0xff]  }
 0x1ab   :  { %1763 = vmatprep.subr.bf16.mxu0 %v3844_v33  ;;  %1849 = vmatprep.subr.bf16.mxu1 %v3847_v34  ;;  %v3925_v33 = vld [vmem:[#allocation8 + $0x1c] ss:$12 sps:$4 sm:$0xff]   ;;  %v3952_v34 = vld [vmem:[#allocation8 + $0xe0] ss:$12 sps:$4 sm:$0xff]  }
 0x1ae   :  { %1764 = vmatpush1.bf16.msra.mxu0 %v3842_v37  ;;  %1850 = vmatpush1.bf16.msra.mxu1 %v3845_v38  ;;  %v3953_v37 = vld [vmem:[#allocation8 + $0x20] ss:$12 sps:$4 sm:$0xff]  }
 0x1af   :  { %1765 = vmatprep.subr.bf16.mxu0 %v3850_v39  ;;  %1851 = vmatprep.subr.bf16.mxu1 %v3853_v40  ;;  %v3928_v38 = vld [vmem:[#allocation8 + $0x34] ss:$12 sps:$4 sm:$0xff]   ;;  %v3957_v39 = vld [vmem:[#allocation8 + $0xf8] ss:$12 sps:$4 sm:$0xff]   ;;  %v3926_v40 = vld [vmem:[#allocation8 + $0x30] ss:$12 sps:$4 sm:$0xff]  }
 0x1b2   :  { %1766 = vmatpush1.bf16.msra.mxu0 %v3848_v41  ;;  %1852 = vmatpush1.bf16.msra.mxu1 %v3851_v42  ;;  %v3958_v41 = vld [vmem:[#allocation8 + $0x38] ss:$12 sps:$4 sm:$0xff]  }
 0x1b3   :  { %1767 = vmatprep.subr.bf16.mxu0 %v3856_v43  ;;  %1853 = vmatprep.subr.bf16.mxu1 %v3859_v44  ;;  %v3931_v42 = vld [vmem:[#allocation8 + $0x4c] ss:$12 sps:$4 sm:$0xff]   ;;  %v3962_v43 = vld [vmem:[#allocation8 + $0x110] ss:$12 sps:$4 sm:$0xff]   ;;  %v3929_v44 = vld [vmem:[#allocation8 + $0x48] ss:$12 sps:$4 sm:$0xff]  }
 0x1b6   :  { %1768 = vmatpush1.bf16.msra.mxu0 %v3854_v45  ;;  %1854 = vmatpush1.bf16.msra.mxu1 %v3857_v46  ;;  %v3934_v45 = vld [vmem:[#allocation8 + $0x64] ss:$12 sps:$4 sm:$0xff]   ;;  %v3967_v46 = vld [vmem:[#allocation8 + $0x128] ss:$12 sps:$4 sm:$0xff]  }
 0x1b7   :  { %1769 = vmatprep.subr.bf16.mxu0 %v3862_v47  ;;  %1855 = vmatprep.subr.bf16.mxu1 %v3865_v48  ;;  %v3932_v47 = vld [vmem:[#allocation8 + $0x60] ss:$12 sps:$4 sm:$0xff]   ;;  %v3968_v48 = vld [vmem:[#allocation8 + $0x68] ss:$12 sps:$4 sm:$0xff]  }
 0x1ba   :  { %1770 = vmatpush1.bf16.msra.mxu0 %v3860_v49  ;;  %1856 = vmatpush1.bf16.msra.mxu1 %v3863_v53  ;;  %v3937_v49 = vld [vmem:[#allocation8 + $0x7c] ss:$12 sps:$4 sm:$0xff]   ;;  %v3972_v53 = vld [vmem:[#allocation8 + $0x140] ss:$12 sps:$4 sm:$0xff]  }
 0x1bb   :  { %1771 = vmatprep.subr.bf16.mxu0 %v3868_v55  ;;  %1857 = vmatprep.subr.bf16.mxu1 %v3871_v56  ;;  %v3935_v55 = vld [vmem:[#allocation8 + $0x78] ss:$12 sps:$4 sm:$0xff]   ;;  %v3973_v56 = vld [vmem:[#allocation8 + $0x80] ss:$12 sps:$4 sm:$0xff]  }
 0x1be   :  { %1772 = vmatpush1.bf16.msra.mxu0 %v3866_v57  ;;  %1858 = vmatpush1.bf16.msra.mxu1 %v3869_v58  ;;  %v3940_v57 = vld [vmem:[#allocation8 + $0x94] ss:$12 sps:$4 sm:$0xff]   ;;  %v3938_v58 = vld [vmem:[#allocation8 + $0x90] ss:$12 sps:$4 sm:$0xff]  }
 0x1bf   :  { %1773 = vmatprep.subr.bf16.mxu0 %v3874_v59  ;;  %1859 = vmatprep.subr.bf16.mxu1 %v3877_v60  ;;  %v3943_v59 = vld [vmem:[#allocation8 + $0xac] ss:$12 sps:$4 sm:$0xff]   ;;  %v3941_v60 = vld [vmem:[#allocation8 + $0xa8] ss:$12 sps:$4 sm:$0xff]  }
 0x1c2   :  { %1774 = vmatpush1.bf16.msra.mxu0 %v3872_v61  ;;  %1860 = vmatpush1.bf16.msra.mxu1 %v3875_v62  ;;  %v3946_v61 = vld [vmem:[#allocation8 + $0xc4] ss:$12 sps:$4 sm:$0xff]   ;;  %v3944_v62 = vld [vmem:[#allocation8 + $0xc0] ss:$12 sps:$4 sm:$0xff]  }
 0x1c3   :  { %1775 = vmatprep.subr.bf16.mxu0 %v3880_v63  ;;  %1861 = vmatprep.subr.bf16.mxu1 %v3883_v1  ;;  %v3951_v63 = vld [vmem:[#allocation8 + $0xdc] ss:$12 sps:$4 sm:$0xff]   ;;  %v3949_v1 = vld [vmem:[#allocation8 + $0xd8] ss:$12 sps:$4 sm:$0xff]  }
 0x1c6   :  { %1776 = vmatpush1.bf16.msra.mxu0 %v3878_v3  ;;  %1862 = vmatpush1.bf16.msra.mxu1 %v3881_v4  ;;  %v3956_v3 = vld [vmem:[#allocation8 + $0xf4] ss:$12 sps:$4 sm:$0xff]   ;;  %v3954_v4 = vld [vmem:[#allocation8 + $0xf0] ss:$12 sps:$4 sm:$0xff]  }
 0x1c7   :  { %1777 = vmatprep.subr.bf16.mxu0 %v3886_v5  ;;  %1863 = vmatprep.subr.bf16.mxu1 %v3889_v6  ;;  %v3961_v5 = vld [vmem:[#allocation8 + $0x10c] ss:$12 sps:$4 sm:$0xff]   ;;  %v3959_v6 = vld [vmem:[#allocation8 + $0x108] ss:$12 sps:$4 sm:$0xff]  }
 0x1ca   :  { %1778 = vmatpush1.bf16.msra.mxu0 %v3884_v7  ;;  %1864 = vmatpush1.bf16.msra.mxu1 %v3887_v8  ;;  %v3966_v7 = vld [vmem:[#allocation8 + $0x124] ss:$12 sps:$4 sm:$0xff]   ;;  %v3964_v8 = vld [vmem:[#allocation8 + $0x120] ss:$12 sps:$4 sm:$0xff]  }
 0x1cb   :  { %1779 = vmatprep.subr.bf16.mxu0 %v3892_v9  ;;  %1865 = vmatprep.subr.bf16.mxu1 %v3895_v10  ;;  %v3971_v9 = vld [vmem:[#allocation8 + $0x13c] ss:$12 sps:$4 sm:$0xff]   ;;  %v3969_v10 = vld [vmem:[#allocation8 + $0x138] ss:$12 sps:$4 sm:$0xff]  }
 0x1ce   :  { %1780 = vmatpush1.bf16.msra.mxu0 %v3890_v11  ;;  %1866 = vmatpush1.bf16.msra.mxu1 %v3893_v12  ;;  %v3976_v11 = vld [vmem:[#allocation8 + $0x154] ss:$12 sps:$4 sm:$0xff]   ;;  %v3977_v12 = vld [vmem:[#allocation8 + $0x158] ss:$12 sps:$4 sm:$0xff]  }
 0x1cf   :  { %1781 = vmatprep.subr.bf16.mxu0 %v3898_v13  ;;  %1867 = vmatprep.subr.bf16.mxu1 %v3901_v14  ;;  %v3974_v13 = vld [vmem:[#allocation8 + $0x150] ss:$12 sps:$4 sm:$0xff]   ;;  %v3978_v14 = vld [vmem:[#allocation8 + $0x98] ss:$12 sps:$4 sm:$0xff]  }
 0x1d2   :  { %1782 = vmatpush1.bf16.msra.mxu0 %v3896_v15  ;;  %1868 = vmatpush1.bf16.msra.mxu1 %v3899_v16  ;;  %v3981_v15 = vld [vmem:[#allocation8 + $0x16c] ss:$12 sps:$4 sm:$0xff]   ;;  %v3982_v16 = vld [vmem:[#allocation8 + $0x170] ss:$12 sps:$4 sm:$0xff]  }
 0x1d3   :  { %1783 = vmatprep.subr.bf16.mxu0 %v3904_v17  ;;  %1869 = vmatprep.subr.bf16.mxu1 %v3907_v18  ;;  %v3979_v17 = vld [vmem:[#allocation8 + $0x168] ss:$12 sps:$4 sm:$0xff]   ;;  %v3983_v18 = vld [vmem:[#allocation8 + $0xb0] ss:$12 sps:$4 sm:$0xff]  }
 0x1d6   :  { %1784 = vmatpush1.bf16.msra.mxu0 %v3902_v19  ;;  %1870 = vmatpush1.bf16.msra.mxu1 %v3905_v20  ;;  %v3986_v19 = vld [vmem:[#allocation8 + $0x184] ss:$12 sps:$4 sm:$0xff]   ;;  %v3987_v20 = vld [vmem:[#allocation8 + $0x248] ss:$12 sps:$4 sm:$0xff]  }
 0x1d7   :  { %1785 = vmatprep.subr.bf16.mxu0 %v3910_v21  ;;  %1871 = vmatprep.subr.bf16.mxu1 %v3913_v22  ;;  %v1052_v21 = vld [vmem:[%s4432_s4] sm:$0xf] }
 0x1d8   :  { %v1057_v22 = vrot.slane %v1052_v21, %v4361_v52 }
 0x1da   :  { %1786 = vmatpush1.bf16.msra.mxu0 %v3908_v23  ;;  %1872 = vmatpush1.bf16.msra.mxu1 %v3911_v24  ;;  %v1065_v23 = vrot.slane %v1052_v21, %v4372_v0  ;;  %v1061_v24 = vrot.slane %v1052_v21, %v4367_v54 }
 0x1db   :  { %1787 = vmatprep.subr.bf16.mxu0 %v3916_v25  ;;  %1873 = vmatprep.subr.bf16.mxu1 %v3919_v26  ;;  %v1069_v25 = vrot.slane %v1052_v21, %v230_v2  ;;  %v4022_v21 = vld [vmem:[#allocation8 + $0x2f0] ss:$12 sps:$4 sm:$0xff]  }
 0x1de   :  { %1788 = vmatpush1.bf16.msra.mxu0 %v3914_v27  ;;  %1874 = vmatpush1.bf16.msra.mxu1 %v3917_v28 }
 0x1df   :  { %2555 = vmatprep.subr.bf16.mxu0 %v3922_v29  ;;  %3427 = vmatprep.subr.bf16.mxu1 %v3947_v30 }
 0x1e1   :  { %1790 = vmatmul.mubr.bf16.vlgmr.msra.gmra.mrb[4].mxu0 %v4378_v35  ;;  %1876 = vmatmul.mubr.bf16.vlgmr.msra.gmra.mrb[4].mxu1 %v4378_v35  ;;  %v3963_v35 = vld [vmem:[#allocation8 + $0x50] ss:$12 sps:$4 sm:$0xff]  }
 0x1e2   :  { %2556 = vmatpush1.bf16.msra.mxu0 %v3920_v31  ;;  %3428 = vmatpush3.bf16.msra.mxu1 %v3948_v32 }
 0x1e3   :  { %2557 = vmatprep.subr.bf16.mxu0 %v3925_v33  ;;  %3429 = vmatprep.subr.bf16.mxu1 %v3952_v34 }
 0x1e6   :  { %2558 = vmatpush1.bf16.msra.mxu0 %v3923_v36  ;;  %3430 = vmatpush3.bf16.msra.mxu1 %v3953_v37 }
 0x1e7   :  { %2559 = vmatprep.subr.bf16.mxu0 %v3928_v38  ;;  %3431 = vmatprep.subr.bf16.mxu1 %v3957_v39 }
 0x1ea   :  { %2560 = vmatpush1.bf16.msra.mxu0 %v3926_v40  ;;  %3432 = vmatpush3.bf16.msra.mxu1 %v3958_v41 }
 0x1eb   :  { %2561 = vmatprep.subr.bf16.mxu0 %v3931_v42  ;;  %3433 = vmatprep.subr.bf16.mxu1 %v3962_v43 }
 0x1ee   :  { %2562 = vmatpush1.bf16.msra.mxu0 %v3929_v44  ;;  %3434 = vmatpush3.bf16.msra.mxu1 %v3963_v35 }
 0x1ef   :  { %2563 = vmatprep.subr.bf16.mxu0 %v3934_v45  ;;  %3435 = vmatprep.subr.bf16.mxu1 %v3967_v46 }
 0x1f2   :  { %2564 = vmatpush1.bf16.msra.mxu0 %v3932_v47  ;;  %3436 = vmatpush3.bf16.msra.mxu1 %v3968_v48 }
 0x1f3   :  { %2565 = vmatprep.subr.bf16.mxu0 %v3937_v49  ;;  %3437 = vmatprep.subr.bf16.mxu1 %v3972_v53 }
 0x1f6   :  { %2566 = vmatpush1.bf16.msra.mxu0 %v3935_v55  ;;  %3438 = vmatpush3.bf16.msra.mxu1 %v3973_v56  ;;  %v3984_v56 = vld [vmem:[#allocation8 + $0x180] ss:$12 sps:$4 sm:$0xff]  }
 0x1f7   :  { %2567 = vmatprep.subr.bf16.mxu0 %v3940_v57  ;;  %3439 = vmatprep.subr.bf16.mxu1 %v3977_v12  ;;  %v3988_v57 = vld [vmem:[#allocation8 + $0x188] ss:$12 sps:$4 sm:$0xff]  }
 0x1f8   :  { %v4011_v12 = vld [vmem:[#allocation8 + $0x1fc] ss:$12 sps:$4 sm:$0xff]  }
 0x1fa   :  { %2568 = vmatpush1.bf16.msra.mxu0 %v3938_v58  ;;  %3440 = vmatpush3.bf16.msra.mxu1 %v3978_v14  ;;  %v3991_v58 = vld [vmem:[#allocation8 + $0x19c] ss:$12 sps:$4 sm:$0xff]   ;;  %v4009_v14 = vld [vmem:[#allocation8 + $0x1f8] ss:$12 sps:$4 sm:$0xff]  }
 0x1fb   :  { %2569 = vmatprep.subr.bf16.mxu0 %v3943_v59  ;;  %3441 = vmatprep.subr.bf16.mxu1 %v3982_v16  ;;  %v3992_v59 = vld [vmem:[#allocation8 + $0x260] ss:$12 sps:$4 sm:$0xff]  }
 0x1fc   :  { %v4016_v16 = vld [vmem:[#allocation8 + $0x214] ss:$12 sps:$4 sm:$0xff]  }
 0x1fe   :  { %2570 = vmatpush1.bf16.msra.mxu0 %v3941_v60  ;;  %3442 = vmatpush3.bf16.msra.mxu1 %v3983_v18  ;;  %v3989_v60 = vld [vmem:[#allocation8 + $0x198] ss:$12 sps:$4 sm:$0xff]   ;;  %v4014_v18 = vld [vmem:[#allocation8 + $0x210] ss:$12 sps:$4 sm:$0xff]  }
 0x1ff   :  { %2571 = vmatprep.subr.bf16.mxu0 %v3946_v61  ;;  %3449 = vmatprep.subr.bf16.mxu1 %v3987_v20  ;;  %v3993_v61 = vld [vmem:[#allocation8 + $0x1a0] ss:$12 sps:$4 sm:$0xff]  }
 0x200   :  { %v4021_v20 = vld [vmem:[#allocation8 + $0x22c] ss:$12 sps:$4 sm:$0xff]  }
 0x202   :  { %2572 = vmatpush1.bf16.msra.mxu0 %v3944_v62  ;;  %v3996_v62 = vld [vmem:[#allocation8 + $0x1b4] ss:$12 sps:$4 sm:$0xff]  }
 0x203   :  { %2573 = vmatprep.subr.bf16.mxu0 %v3951_v63  ;;  %v3997_v63 = vld [vmem:[#allocation8 + $0x278] ss:$12 sps:$4 sm:$0xff]  }
 0x206   :  { %2574 = vmatpush1.bf16.msra.mxu0 %v3949_v1  ;;  %v3994_v1 = vld [vmem:[#allocation8 + $0x1b0] ss:$12 sps:$4 sm:$0xff]  }
 0x207   :  { %2575 = vmatprep.subr.bf16.mxu0 %v3956_v3  ;;  %v3998_v3 = vld [vmem:[#allocation8 + $0x1b8] ss:$12 sps:$4 sm:$0xff]  }
 0x20a   :  { %2576 = vmatpush1.bf16.msra.mxu0 %v3954_v4  ;;  %v4001_v4 = vld [vmem:[#allocation8 + $0x1cc] ss:$12 sps:$4 sm:$0xff]  }
 0x20b   :  { %2577 = vmatprep.subr.bf16.mxu0 %v3961_v5  ;;  %v4002_v5 = vld [vmem:[#allocation8 + $0x290] ss:$12 sps:$4 sm:$0xff]  }
 0x20e   :  { %2578 = vmatpush1.bf16.msra.mxu0 %v3959_v6  ;;  %v3999_v6 = vld [vmem:[#allocation8 + $0x1c8] ss:$12 sps:$4 sm:$0xff]  }
 0x20f   :  { %2579 = vmatprep.subr.bf16.mxu0 %v3966_v7  ;;  %v4003_v7 = vld [vmem:[#allocation8 + $0x1d0] ss:$12 sps:$4 sm:$0xff]  }
 0x212   :  { %2580 = vmatpush1.bf16.msra.mxu0 %v3964_v8  ;;  %v4006_v8 = vld [vmem:[#allocation8 + $0x1e4] ss:$12 sps:$4 sm:$0xff]  }
 0x213   :  { %2581 = vmatprep.subr.bf16.mxu0 %v3971_v9  ;;  %v4007_v9 = vld [vmem:[#allocation8 + $0x2a8] ss:$12 sps:$4 sm:$0xff]  }
 0x216   :  { %2582 = vmatpush1.bf16.msra.mxu0 %v3969_v10  ;;  %v4004_v10 = vld [vmem:[#allocation8 + $0x1e0] ss:$12 sps:$4 sm:$0xff]  }
 0x217   :  { %2583 = vmatprep.subr.bf16.mxu0 %v3976_v11  ;;  %v4008_v11 = vld [vmem:[#allocation8 + $0x1e8] ss:$12 sps:$4 sm:$0xff]  }
 0x21a   :  { %2584 = vmatpush1.bf16.msra.mxu0 %v3974_v13  ;;  %v4012_v13 = vld [vmem:[#allocation8 + $0x2c0] ss:$12 sps:$4 sm:$0xff]  }
 0x21b   :  { %2585 = vmatprep.subr.bf16.mxu0 %v3981_v15  ;;  %v4013_v15 = vld [vmem:[#allocation8 + $0x200] ss:$12 sps:$4 sm:$0xff]  }
 0x21e   :  { %2586 = vmatpush1.bf16.msra.mxu0 %v3979_v17  ;;  %v4017_v17 = vld [vmem:[#allocation8 + $0x2d8] ss:$12 sps:$4 sm:$0xff]  }
 0x21f   :  { %2598 = vmatprep.subr.bf16.mxu0 %v3986_v19  ;;  %v4018_v19 = vld [vmem:[#allocation8 + $0x218] ss:$12 sps:$4 sm:$0xff]  }
 0x2b4   :  { %v1791_v26 = vpop.f32.mrb[4].mxu0  ;;  %v1877_v27 = vpop.f32.mrb[4].mxu1 }
 0x2b5   :  { %v3530_v28 = vadd.f32 %v1791_v26, %v1057_v22  ;;  %v3534_v29 = vadd.f32 %v1877_v27, %v1065_v23  ;;  %v1793_v30 = vpop.f32.mrb[5].mxu0  ;;  %v1879_v31 = vpop.f32.mrb[5].mxu1  ;;  %v4029_v26 = vld [vmem:[#allocation8 + $0x25c] ss:$12 sps:$4 sm:$0xff]   ;;  %v4027_v27 = vld [vmem:[#allocation8 + $0x258] ss:$12 sps:$4 sm:$0xff]  }
 0x2b6   :  { %v3531_v32 = vadd.f32 %v1793_v30, %v1061_v24  ;;  %v3535_v33 = vadd.f32 %v1879_v31, %v1069_v25  ;;  %v1795_v34 = vpop.f32.mrb[6].mxu0  ;;  %v1881_v36 = vpop.f32.mrb[6].mxu1  ;;  %v4035_v30 = vld [vmem:[#allocation8 + $0x28c] ss:$12 sps:$4 sm:$0xff]   ;;  %v4033_v31 = vld [vmem:[#allocation8 + $0x288] ss:$12 sps:$4 sm:$0xff]  }
 0x2b7   :  { %v3532_v37 = vadd.f32 %v1795_v34, %v1057_v22  ;;  %v3536_v38 = vadd.f32 %v1881_v36, %v1065_v23  ;;  %v1797_v39 = vpop.f32.mrb[7].mxu0  ;;  %v1883_v40 = vpop.f32.mrb[7].mxu1  ;;  %v1886_v43 = vmax.f32 %v3530_v28, 0.0  ;;  %v1888_v44 = vmax.f32 %v3534_v29, 0.0  ;;  %v4019_v22 = vld [vmem:[#allocation8 + $0x228] ss:$12 sps:$4 sm:$0xff]  }
 0x2b8   :  { %v3533_v41 = vadd.f32 %v1797_v39, %v1061_v24  ;;  %v3537_v42 = vadd.f32 %v1883_v40, %v1069_v25  ;;  %v1887_v35 = vmax.f32 %v3531_v32, 0.0  ;;  %v1889_v45 = vmax.f32 %v3535_v33, 0.0  ;;  %v4023_v23 = vld [vmem:[#allocation8 + $0x230] ss:$12 sps:$4 sm:$0xff]   ;;  %v4024_v25 = vld [vmem:[#allocation8 + $0x240] ss:$12 sps:$4 sm:$0xff]  }
 0x2b9   :  { %v1890_v51 = vmax.f32 %v3532_v37, 0.0  ;;  %v1892_v2 = vmax.f32 %v3536_v38, 0.0  ;;  %v4026_v24 = vld [vmem:[#allocation8 + $0x244] ss:$12 sps:$4 sm:$0xff]   ;;  %v4032_v28 = vld [vmem:[#allocation8 + $0x274] ss:$12 sps:$4 sm:$0xff]  }
 0x2ba   :  { %v1891_v46 = vmax.f32 %v3533_v41, 0.0  ;;  %v1893_v47 = vmax.f32 %v3537_v42, 0.0  ;;  %v4030_v29 = vld [vmem:[#allocation8 + $0x270] ss:$12 sps:$4 sm:$0xff]   ;;  %v4036_v33 = vld [vmem:[#allocation8 + $0x2a0] ss:$12 sps:$4 sm:$0xff]  }
 0x2bb   :  { %v1894_v48 = vpack.c.bf16 %v1890_v51, %v1886_v43  ;;  %v4390_v49 = vpack.c.bf16 %v1892_v2, %v1888_v44  ;;  %v4038_v32 = vld [vmem:[#allocation8 + $0x2a4] ss:$12 sps:$4 sm:$0xff]   ;;  %v4041_v34 = vld [vmem:[#allocation8 + $0x2bc] ss:$12 sps:$4 sm:$0xff]   ;;  %v4044_v37 = vld [vmem:[#allocation8 + $0x2d4] ss:$12 sps:$4 sm:$0xff]  }
 0x2bc   :  { %v1895_v53 = vpack.c.bf16 %v1891_v46, %v1887_v35  ;;  %v1897_v55 = vpack.c.bf16 %v1893_v47, %v1889_v45  ;;  %v4039_v36 = vld [vmem:[#allocation8 + $0x2b8] ss:$12 sps:$4 sm:$0xff]   ;;  %v4042_v38 = vld [vmem:[#allocation8 + $0x2d0] ss:$12 sps:$4 sm:$0xff]   ;;  %v4045_v40 = vld [vmem:[#allocation8 + $0x2e8] ss:$12 sps:$4 sm:$0xff]  }
 0x2bd   :  { %v4047_v39 = vld [vmem:[#allocation8 + $0x2ec] ss:$12 sps:$4 sm:$0xff]   ;;  %v4048_v41 = vld [vmem:[#allocation10 + $0x40] sm:$0xff]   ;;  %v4052_v51 = vld [vmem:[#allocation10 + $0x50] sm:$0xff]  }
 0x2be   :  { %2587 = vmatprep.mubr.bf16.mxu0 %v1895_v53  ;;  %2673 = vmatprep.mubr.bf16.mxu1 %v1895_v53  ;;  %v4049_v42 = vld [vmem:[#allocation10] sm:$0xff]   ;;  %v4050_v43 = vld [vmem:[#allocation10 + $0x48] sm:$0xff]   ;;  %v4053_v2 = vld [vmem:[#allocation10 + $0x10] sm:$0xff]  }
 0x2bf   :  { %2588 = vmatmul.mubr.bf16.vlgmr.msra.gmra.mrb[8].mxu0 %v1894_v48  ;;  %2674 = vmatmul.mubr.bf16.vlgmr.msra.gmra.mrb[8].mxu1 %v1894_v48  ;;  %v4051_v44 = vld [vmem:[#allocation10 + $0x8] sm:$0xff]   ;;  %v4054_v35 = vld [vmem:[#allocation10 + $0x58] sm:$0xff]   ;;  %v4056_v46 = vld [vmem:[#allocation10 + $0x60] sm:$0xff]  }
 0x2c0   :  { %2599 = vmatpush1.bf16.msra.mxu0 %v3984_v56  ;;  %3450 = vmatpush3.bf16.msra.mxu1 %v3988_v57  ;;  %v4055_v45 = vld [vmem:[#allocation10 + $0x18] sm:$0xff]   ;;  %v4057_v47 = vld [vmem:[#allocation10 + $0x20] sm:$0xff]   ;;  %v4058_v48 = vld [vmem:[#allocation10 + $0x68] sm:$0xff]  }
 0x2c1   :  { %2630 = vmatprep.mubr.bf16.mxu0 %v1897_v55  ;;  %2714 = vmatprep.mubr.bf16.mxu1 %v1897_v55  ;;  %v4060_v53 = vld [vmem:[#allocation10 + $0x70] sm:$0xff]   ;;  %v4062_v56 = vld [vmem:[#allocation10 + $0x78] sm:$0xff]  }
 0x2c2   :  { %2600 = vmatprep.subr.bf16.mxu0 %v3991_v58  ;;  %3451 = vmatprep.subr.bf16.mxu1 %v3992_v59  ;;  %v4061_v55 = vld [vmem:[#allocation10 + $0x30] sm:$0xff]   ;;  %v4063_v57 = vld [vmem:[#allocation10 + $0x38] sm:$0xff]   ;;  %v4233_v58 = vmov 0.0  }
 0x2c4   :  { %2601 = vmatpush1.bf16.msra.mxu0 %v3989_v60  ;;  %3452 = vmatpush3.bf16.msra.mxu1 %v3993_v61 }
 0x2c5   :  { %2602 = vmatprep.subr.bf16.mxu0 %v3996_v62  ;;  %3453 = vmatprep.subr.bf16.mxu1 %v3997_v63 }
 0x2c8   :  { %2603 = vmatpush1.bf16.msra.mxu0 %v3994_v1  ;;  %3454 = vmatpush3.bf16.msra.mxu1 %v3998_v3  ;;  %v2026_v3 = vld [vmem:[%s4434_s6] sm:$0x7] }
 0x2c9   :  { %2604 = vmatprep.subr.bf16.mxu0 %v4001_v4  ;;  %3455 = vmatprep.subr.bf16.mxu1 %v4002_v5  ;;  %v2039_v4 = vrot.slane %v2026_v3, %v4372_v0 }
 0x2cc   :  { %2605 = vmatpush1.bf16.msra.mxu0 %v3999_v6  ;;  %3456 = vmatpush3.bf16.msra.mxu1 %v4003_v7 }
 0x2cd   :  { %2606 = vmatprep.subr.bf16.mxu0 %v4006_v8  ;;  %3457 = vmatprep.subr.bf16.mxu1 %v4007_v9 }
 0x2d0   :  { %2607 = vmatpush1.bf16.msra.mxu0 %v4004_v10  ;;  %3458 = vmatpush3.bf16.msra.mxu1 %v4008_v11 }
 0x2d1   :  { %2608 = vmatprep.subr.bf16.mxu0 %v4011_v12  ;;  %3459 = vmatprep.subr.bf16.mxu1 %v4012_v13 }
 0x2d4   :  { %2609 = vmatpush1.bf16.msra.mxu0 %v4009_v14  ;;  %3460 = vmatpush3.bf16.msra.mxu1 %v4013_v15 }
 0x2d5   :  { %2610 = vmatprep.subr.bf16.mxu0 %v4016_v16  ;;  %3461 = vmatprep.subr.bf16.mxu1 %v4017_v17 }
 0x2d8   :  { %2611 = vmatpush1.bf16.msra.mxu0 %v4014_v18  ;;  %3462 = vmatpush3.bf16.msra.mxu1 %v4018_v19  ;;  %v2031_v18 = vrot.slane %v2026_v3, %v4361_v52  ;;  %v2035_v19 = vrot.slane %v2026_v3, %v4367_v54  ;;  %v4065_v52 = vld [vmem:[#allocation10 + $0x88] sm:$0xff]   ;;  %v4066_v54 = vld [vmem:[#allocation10 + $0x90] sm:$0xff]  }
 0x2d9   :  { %2612 = vmatprep.subr.bf16.mxu0 %v4021_v20  ;;  %3463 = vmatprep.subr.bf16.mxu1 %v4022_v21 }
 0x2dc   :  { %2613 = vmatpush1.bf16.msra.mxu0 %v4019_v22  ;;  %3464 = vmatpush3.bf16.msra.mxu1 %v4023_v23 }
 0x2dd   :  { %2614 = vmatprep.subr.bf16.mxu0 %v4026_v24  ;;  %3471 = vmatprep.subr.bf16.mxu1 %v4048_v41 }
 0x2df   :  { %2715 = vmatmul.mubr.bf16.vlgmr.msra.gmra.mrb[12].mxu1 %v4390_v49 }
 0x2e0   :  { %2615 = vmatpush1.bf16.msra.mxu0 %v4024_v25  ;;  %3472 = vmatpush3.bf16.msra.mxu1 %v4049_v42 }
 0x2e1   :  { %2616 = vmatprep.subr.bf16.mxu0 %v4029_v26  ;;  %3473 = vmatprep.subr.bf16.mxu1 %v4050_v43 }
 0x2e4   :  { %2617 = vmatpush1.bf16.msra.mxu0 %v4027_v27  ;;  %3474 = vmatpush3.bf16.msra.mxu1 %v4051_v44 }
 0x2e5   :  { %2618 = vmatprep.subr.bf16.mxu0 %v4032_v28  ;;  %3475 = vmatprep.subr.bf16.mxu1 %v4052_v51 }
 0x2e8   :  { %2619 = vmatpush1.bf16.msra.mxu0 %v4030_v29  ;;  %3476 = vmatpush3.bf16.msra.mxu1 %v4053_v2  ;;  %v3393_v2 = vld [vmem:[%s4436_s8] ss:$0 sm:$0xff] }
 0x2e9   :  { %2620 = vmatprep.subr.bf16.mxu0 %v4035_v30  ;;  %3477 = vmatprep.subr.bf16.mxu1 %v4054_v35  ;;  %v3014_v35 = vand.u32 127, %v216_v50 }
 0x2eb   :  { %vm3015_vm2 = vcmp.lt.s32.totalorder %v3014_v35, 5 }
 0x2ec   :  { %2621 = vmatpush1.bf16.msra.mxu0 %v4033_v31  ;;  %3478 = vmatpush3.bf16.msra.mxu1 %v4055_v45 }
 0x2ed   :  { %2622 = vmatprep.subr.bf16.mxu0 %v4038_v32  ;;  %3479 = vmatprep.subr.bf16.mxu1 %v4056_v46 }
 0x2f0   :  { %2623 = vmatpush1.bf16.msra.mxu0 %v4036_v33  ;;  %3480 = vmatpush3.bf16.msra.mxu1 %v4057_v47  ;;  %v4064_v33 = vld [vmem:[#allocation10 + $0x80] sm:$0xff]  }
 0x2f1   :  { %2624 = vmatprep.subr.bf16.mxu0 %v4041_v34  ;;  %3481 = vmatprep.subr.bf16.mxu1 %v4058_v48  ;;  %v4067_v34 = vld [vmem:[#allocation10 + $0x98] sm:$0xff]  }
 0x2f4   :  { %2625 = vmatpush1.bf16.msra.mxu0 %v4039_v36  ;;  %v4068_v36 = vld [vmem:[#allocation10 + $0xa0] sm:$0xff]  }
 0x2f5   :  { %2626 = vmatprep.subr.bf16.mxu0 %v4044_v37  ;;  %v4069_v37 = vld [vmem:[#allocation10 + $0xa8] sm:$0xff]  }
 0x2f8   :  { %2627 = vmatpush1.bf16.msra.mxu0 %v4042_v38  ;;  %v4070_v38 = vld [vmem:[#allocation10 + $0xb0] sm:$0xff]  }
 0x2f9   :  { %2628 = vmatprep.subr.bf16.mxu0 %v4047_v39  ;;  %v4071_v39 = vld [vmem:[#allocation10 + $0xb8] sm:$0xff]  }
 0x2fc   :  { %2629 = vmatpush1.bf16.msra.mxu0 %v4045_v40 }
 0x2ff   :  { %2631 = vmatmul.mubr.bf16.vlgmr.msra.gmra.mrb[8].mxu0 %v4390_v49  ;;  %v4059_v49 = vld [vmem:[#allocation10 + $0x28] sm:$0xff]  }
 0x300   :  { %3482 = vmatpush3.bf16.msra.mxu1 %v4059_v49 }
 0x301   :  { %3483 = vmatprep.subr.bf16.mxu1 %v4060_v53 }
 0x304   :  { %3484 = vmatpush3.bf16.msra.mxu1 %v4061_v55 }
 0x305   :  { %3485 = vmatprep.subr.bf16.mxu1 %v4062_v56 }
 0x308   :  { %3486 = vmatpush3.bf16.msra.mxu1 %v4063_v57 }
 0x309   :  { %3502 = vmatprep.subr.bf16.mxu1 %v4233_v58 }
 0x392   :  { %v3443_v59 = vpop.f32.mrb[8].mxu1 }
 0x393   :  { %v3444_v60 = vpop.f32.mrb[9].mxu1 }
 0x394   :  { %v3445_v61 = vadd.f32 %v3444_v60, %v3443_v59  ;;  %v3446_v62 = vpop.f32.mrb[10].mxu1 }
 0x395   :  { %v3447_v63 = vpop.f32.mrb[11].mxu1 }
 0x396   :  { %v3448_v1 = vadd.f32 %v3447_v63, %v3446_v62  ;;  %v2676_v7 = vadd.f32 %v3445_v61, %v2039_v4 }
 0x398   :  { %v2679_v11 = vadd.f32 %v3448_v1, %v2039_v4 }
 0x3b2   :  { %v3465_v5 = vpop.f32.mrb[12].mxu1 }
 0x3b3   :  { %v3466_v6 = vpop.f32.mrb[13].mxu1 }
 0x3b4   :  { %v3467_v8 = vadd.f32 %v3466_v6, %v3465_v5  ;;  %v3468_v9 = vpop.f32.mrb[14].mxu1 }
 0x3b5   :  { %v3469_v10 = vpop.f32.mrb[15].mxu1 }
 0x3b6   :  { %v2717_v12 = vadd.f32 %v3467_v8, %v2676_v7  ;;  %v3470_v13 = vadd.f32 %v3469_v10, %v3468_v9 }
 0x3b8   :  { %v2720_v14 = vadd.f32 %v3470_v13, %v2679_v11  ;;  %v2725_v15 = vmax.f32 %v2717_v12, 0.0 }
 0x3ba   :  { %v2728_v16 = vmax.f32 %v2720_v14, 0.0 }
 0x3bc   :  { %v2731_v17 = vpack.c.bf16 %v2728_v16, %v2725_v15 }
 0x3d2   :  { %v2632_v20 = vpop.f32.mrb[8].mxu0 }
 0x3d3   :  { %v3538_v21 = vadd.f32 %v2632_v20, %v2031_v18  ;;  %v2634_v0 = vpop.f32.mrb[9].mxu0 }
 0x3d4   :  { %v3539_v22 = vadd.f32 %v2634_v0, %v2035_v19  ;;  %v2636_v23 = vpop.f32.mrb[10].mxu0 }
 0x3d5   :  { %v3540_v24 = vadd.f32 %v2636_v23, %v2031_v18  ;;  %v2638_v25 = vpop.f32.mrb[11].mxu0  ;;  %v2723_v27 = vmax.f32 %v3538_v21, 0.0 }
 0x3d6   :  { %v3541_v26 = vadd.f32 %v2638_v25, %v2035_v19  ;;  %v2724_v29 = vmax.f32 %v3539_v22, 0.0 }
 0x3d7   :  { %v2726_v28 = vmax.f32 %v3540_v24, 0.0 }
 0x3d8   :  { %v2727_v30 = vmax.f32 %v3541_v26, 0.0 }
 0x3d9   :  { %v2729_v31 = vpack.c.bf16 %v2726_v28, %v2723_v27 }
 0x3da   :  { %v2730_v32 = vpack.c.bf16 %v2727_v30, %v2724_v29 }
 0x3dc   :  { %2963 = vmatprep.mubr.bf16.mxu1 %v2730_v32 }
 0x3dd   :  { %2964 = vmatmul.mubr.bf16.vlgmr.msra.gmra.mrb[16].mxu1 %v2729_v31 }
 0x3de   :  { %3503 = vmatpush3.bf16.msra.mxu1 %v4064_v33  ;;  %3518 = vmatprep.mubr.msk.bf16.mxu1 %vm4234_vm1, %v4233_v58 }
 0x3df   :  { %3504 = vmatprep.subr.bf16.mxu1 %v4233_v58 }
 0x3e2   :  { %3505 = vmatpush3.bf16.msra.mxu1 %v4065_v52 }
 0x3e3   :  { %3506 = vmatprep.subr.bf16.mxu1 %v4233_v58 }
 0x3e6   :  { %3507 = vmatpush3.bf16.msra.mxu1 %v4066_v54 }
 0x3e7   :  { %3508 = vmatprep.subr.bf16.mxu1 %v4233_v58 }
 0x3ea   :  { %3509 = vmatpush3.bf16.msra.mxu1 %v4067_v34 }
 0x3eb   :  { %3510 = vmatprep.subr.bf16.mxu1 %v4233_v58 }
 0x3ee   :  { %3511 = vmatpush3.bf16.msra.mxu1 %v4068_v36 }
 0x3ef   :  { %3512 = vmatprep.subr.bf16.mxu1 %v4233_v58 }
 0x3f2   :  { %3513 = vmatpush3.bf16.msra.mxu1 %v4069_v37 }
 0x3f3   :  { %3514 = vmatprep.subr.bf16.mxu1 %v4233_v58 }
 0x3f6   :  { %3515 = vmatpush3.bf16.msra.mxu1 %v4070_v38 }
 0x3f7   :  { %3516 = vmatprep.subr.bf16.mxu1 %v4233_v58 }
 0x3fa   :  { %3517 = vmatpush3.bf16.msra.mxu1 %v4071_v39 }
 0x3fd   :  { %3519 = vmatmul.mubr.bf16.vlgmr.msra.gmra.mrb[20].mxu1 %v2731_v17 }
 0x4b0   :  { %v3487_v40 = vpop.f32.mrb[16].mxu1 }
 0x4b1   :  { %v3488_v41 = vpop.f32.mrb[17].mxu1 }
 0x4b2   :  { %v3489_v42 = vadd.f32 %v3488_v41, %v3487_v40  ;;  %v3490_v43 = vpop.f32.mrb[18].mxu1 }
 0x4b3   :  { %v3491_v44 = vpop.f32.mrb[19].mxu1 }
 0x4b4   :  { %v3492_v51 = vadd.f32 %v3491_v44, %v3490_v43  ;;  %v2966_v45 = vadd.f32 %v3489_v42, %v3393_v2 }
 0x4b6   :  { %v2969_v49 = vadd.f32 %v3492_v51, %v3393_v2 }
 0x4d0   :  { %v3006_v46 = vpop.f32.mrb[20].mxu1 }
 0x4d1   :  { %v3007_v47 = vadd.f32 %v3006_v46, %v2966_v45  ;;  %v3520_v48 = vpop.f32.mrb[21].mxu1 }
 0x4d2   :  { %v3009_v53 = vpop.f32.mrb[22].mxu1 }
 0x4d3   :  { %v3010_v55 = vadd.f32 %v3009_v53, %v2969_v49  ;;  %v3521_v56 = vpop.f32.mrb[23].mxu1  ;;  %v3016_v57 = vsel %vm3015_vm2, %v3007_v47, -inf }
 0x4d4   :  { %3018 = vmax.xlane.f32.xlu0 %v3016_v57 }
 0x4d5   :  { %v3017_v58 = vsel %vm3015_vm2, %v3010_v55, -inf }
 0x4d8   :  { %3020 = vmax.xlane.f32.xlu0 %v3017_v58 }
 0x561   :  { %v3019_v59 = vpop.xlane.xlu0 %3018 }
 0x562   :  { %v3022_v60 = vsub.f32 %v3016_v57, %v3019_v59 }
 0x564   :  { %v3024_v61 = vmul.f32 1.442695, %v3022_v60 }
 0x565   :  { %v3021_v62 = vpop.xlane.xlu0 %3020 }
 0x566   :  { %4072 = vpow2.f32 %v3024_v61  ;;  %v3023_v63 = vsub.f32 %v3017_v58, %v3021_v62 }
 0x568   :  { %v3026_v50 = vmul.f32 1.442695, %v3023_v63 }
 0x56a   :  { %4074 = vpow2.f32 %v3026_v50 }
 0x570   :  { %v4073_v1 = vpop.eup %4072 }
 0x571   :  { %3028 = vadd.xlane.f32.xlu1 %v4073_v1 }
 0x574   :  { %v4075_v3 = vpop.eup %4074 }
 0x575   :  { %3030 = vadd.xlane.f32.xlu1 %v4075_v3 }
 0x5fe   :  { %v3029_v4 = vpop.xlane.xlu1 %3028 }
 0x5ff   :  { %4076 = vrcp.f32 %v3029_v4 }
 0x602   :  { %v3031_v5 = vpop.xlane.xlu1 %3030 }
 0x603   :  { %4078 = vrcp.f32 %v3031_v5 }
 0x609   :  { %v4077_v6 = vpop.eup %4076 }
 0x60a   :  { %v3036_v8 = vmul.f32 %v4077_v6, %v4073_v1 }
 0x60d   :  { %v4079_v7 = vpop.eup %4078 }
 0x60e   :  { %v3037_v9 = vmul.f32 %v4079_v7, %v4075_v3 }
 0x610   :  { %v3425_v10 = vpack.c.bf16 %v3037_v9, %v3036_v8 }
 0x612   :  { %3426 = vst [vmem:[#allocation11] sm:$0xff] %v3425_v10  }
 0x613   :  { %3052 = vsyncadd [#allocation4], 64  ;;  %s4235_s8 = smov [#allocation11]  }
 0x614   :  { %s3053_s14 = sshll.u32 %s4235_s8, 4  ;;  %s3054_s14 = int_to_ptr.vmem [resolvable:$true] %s3053_s14 }
 0x615   :  { %s4190_s15 = scalar_lea.vmem %s3054_s14, 64  ;;  %s4194_s17 = scalar_lea.vmem %s3054_s14, 128 }
 0x616   :  { %p4191_p12 = scmp.ne.s32.totalorder %s3054_s14, %s4190_s15  ;;  %p4195_p13 = scmp.lt.s32.totalorder %s3054_s14, %s3054_s14 }
 0x617   :  { %p4196_p0 = scmp.lt.s32.totalorder %s4194_s17, %s4190_s15 }
 0x619   :  { %p4197_p1 = por %p4196_p0, %p4195_p13 }
 0x61b   :  { %p4198_p2 = pnand %p4197_p1, %p4191_p12 }
 0x61d   :  { %4201 = shalt.err (!%p4198_p2)
}
 0x61e   :  { %s4202_s22 = scalar_lea.hbm %s4437_s9, 64 }
 0x61f   :  { %p4203_p3 = scmp.ne.s32.totalorder %s4437_s9, %s4202_s22  ;;  %p4206_p4 = scmp.lt.u32.totalorder %s4202_s22, %s4437_s9 }
 0x621   :  { %p4208_p5 = pnand %p4206_p4, %p4203_p3 }
 0x623   :  { %4211 = shalt.err (!%p4208_p5)
}
 0x624   :  { %3059 = dma.vmem_to_hbm [thread:$0]  %s3054_s14, 64, %s4437_s9, [#allocation4], %s4231_s3, %s4231_s3, %s4232_s19  }
 0x625   :  { %4218 = dma.done.wait [#allocation4], 128  }
 0x626   :  { %4219 = vsyncadd [#allocation4], 4294967168 }
 0x627   :  { %3063 = vsyncpa [#allocation3], 1 }
 0x628   :  { %3064 = vsyncpa [#allocation6], 1 }
 0x629   :  { %3065 = vsyncpa [#allocation9], 1 }
 0x62a   :  { %3066 = vsyncpa [#allocation4], 1 }

</bundles_post_ra>
